<compile_context>
chip_gen: v6e
topology: v6e:2x2x1
jax: 0.10.0
libtpu: 0.0.40
codegen_flags: <defaults>
</compile_context>

<pallas_src>
import functools

import numpy as np
import jax
import jax.numpy as jnp
from jax import lax
from jax.experimental import pallas as pl
from jax.experimental.pallas import tpu as pltpu


# ----------------------------------------------------------------------------
# shared in-kernel helpers
# ----------------------------------------------------------------------------

_TAPS = ((-1, -1), (-1, 0), (-1, 1),
         (0, -1), (0, 0), (0, 1),
         (1, -1), (1, 0), (1, 1))

_SQRT_2_OVER_PI = 0.7978845608028654


def _gelu(x):
    # tanh approximation of GELU (EUP-friendly).
    return 0.5 * x * (1.0 + jnp.tanh(_SQRT_2_OVER_PI * (x + 0.044715 * x * x * x)))


def _dwconv_flat(v, k, masks, W):
    """Depthwise 3x3 conv (padding=1) on a (C, H*W) tile.

    v:     (C, H*W)   activations, flattened spatial on lanes
    k:     (C, 9)     per-channel taps, tap order == _TAPS
    masks: (9, H*W)   1.0 where the shifted source pixel is in-bounds
    """
    acc = v * k[:, 4:5]                      # center tap: mask is identically 1
    for t, (oy, ox) in enumerate(_TAPS):
        if t == 4:
            continue
        d = oy * W + ox
        sh = jnp.roll(v, -d, axis=1)
        acc = acc + sh * masks[t:t + 1, :] * k[:, t:t + 1]
    return acc


def make_shift_masks(H, W):
    hh = np.arange(H * W) // W
    ww = np.arange(H * W) % W
    m = np.stack(
        [((hh + oy >= 0) & (hh + oy < H) & (ww + ox >= 0) & (ww + ox < W)).astype(np.float32)
         for (oy, ox) in _TAPS],
        axis=0)
    return jnp.asarray(m)  # (9, H*W)


def _layernorm_cols(x, w, b, eps):
    """Channel LayerNorm on a (C, HW) tile (stats over sublanes / channels)."""
    mu = jnp.mean(x, axis=0, keepdims=True)
    xc = x - mu
    var = jnp.mean(xc * xc, axis=0, keepdims=True)
    return w * (xc * lax.rsqrt(var + eps)) + b


# ----------------------------------------------------------------------------
# Kernel A: norm1 + conv_match (3x3 as one im2col matmul) + conv_assembly (1x1)
# ----------------------------------------------------------------------------

def _norm_nla_embed_kernel(x_ref, lw_ref, lb_ref, wm_ref, bm_ref, wa_ref, ba_ref,
                           m_ref, xn_ref, xe_ref, ye_ref, *, W, eps):
    x = x_ref[0]                                                   # (C, HW) f32
    xn = _layernorm_cols(x, lw_ref[...], lb_ref[...], eps)         # norm1 fused
    xn_ref[0] = xn.astype(xn_ref.dtype)

    masks = m_ref[...]
    cols = []
    for t, (oy, ox) in enumerate(_TAPS):
        d = oy * W + ox
        if d == 0:
            cols.append(xn)                                        # center: mask == 1
        else:
            cols.append(jnp.roll(xn, -d, axis=1) * masks[t:t + 1, :])
    patches = jnp.concatenate(cols, axis=0).astype(jnp.bfloat16)   # (9*C, HW) im2col
    xn_bf = xn.astype(jnp.bfloat16)

    xe = jnp.dot(wm_ref[...], patches, preferred_element_type=jnp.float32) + bm_ref[...]
    ye = jnp.dot(wa_ref[...], xn_bf, preferred_element_type=jnp.float32) + ba_ref[...]
    xe_ref[0] = xe.astype(xe_ref.dtype)
    ye_ref[0] = ye.astype(ye_ref.dtype)


def norm_nla_embed_pallas(x, lw, lb, wm_mat, bm, wa_mat, ba, masks, W, eps=1e-6):
    B, C, HW = x.shape
    Cm = wm_mat.shape[0]
    kern = functools.partial(_norm_nla_embed_kernel, W=W, eps=eps)
    return pl.pallas_call(
        kern,
        out_shape=(jax.ShapeDtypeStruct((B, C, HW), x.dtype),   # xn (normed input)
                   jax.ShapeDtypeStruct((B, Cm, HW), x.dtype),  # x_embed
                   jax.ShapeDtypeStruct((B, C, HW), x.dtype)),  # y_embed
        grid_spec=pltpu.PrefetchScalarGridSpec(
            num_scalar_prefetch=0,
            grid=(B,),
            in_specs=[
                pl.BlockSpec((1, C, HW), lambda b: (b, 0, 0)),
                pl.BlockSpec((C, 1), lambda b: (0, 0)),
                pl.BlockSpec((C, 1), lambda b: (0, 0)),
                pl.BlockSpec((Cm, 9 * C), lambda b: (0, 0)),
                pl.BlockSpec((Cm, 1), lambda b: (0, 0)),
                pl.BlockSpec((C, C), lambda b: (0, 0)),
                pl.BlockSpec((C, 1), lambda b: (0, 0)),
                pl.BlockSpec((9, HW), lambda b: (0, 0)),
            ],
            out_specs=[pl.BlockSpec((1, C, HW), lambda b: (b, 0, 0)),
                       pl.BlockSpec((1, Cm, HW), lambda b: (b, 0, 0)),
                       pl.BlockSpec((1, C, HW), lambda b: (b, 0, 0))],
        ),
        compiler_params=pltpu.CompilerParams(dimension_semantics=("parallel",)),
    )(x, lw.reshape(C, 1), lb.reshape(C, 1), wm_mat, bm.reshape(Cm, 1),
      wa_mat, ba.reshape(C, 1), masks)


# ----------------------------------------------------------------------------
# Kernel B: conv_local branch (dw3x3 -> GELU -> dw3x3), fully fused
# ----------------------------------------------------------------------------

def _conv_local_kernel(x_ref, k1_ref, b1_ref, k2_ref, b2_ref, m_ref, o_ref, *, W):
    x = x_ref[0]
    masks = m_ref[...]
    h1 = _dwconv_flat(x, k1_ref[...], masks, W) + b1_ref[...]
    h1 = _gelu(h1)
    h2 = _dwconv_flat(h1, k2_ref[...], masks, W) + b2_ref[...]
    o_ref[0] = h2.astype(o_ref.dtype)


def conv_local_pallas(x, k1, b1, k2, b2, masks, W):
    B, C, HW = x.shape
    kern = functools.partial(_conv_local_kernel, W=W)
    return pl.pallas_call(
        kern,
        out_shape=jax.ShapeDtypeStruct((B, C, HW), x.dtype),
        grid_spec=pltpu.PrefetchScalarGridSpec(
            num_scalar_prefetch=0,
            grid=(B,),
            in_specs=[
                pl.BlockSpec((1, C, HW), lambda b: (b, 0, 0)),
                pl.BlockSpec((C, 9), lambda b: (0, 0)),
                pl.BlockSpec((C, 1), lambda b: (0, 0)),
                pl.BlockSpec((C, 9), lambda b: (0, 0)),
                pl.BlockSpec((C, 1), lambda b: (0, 0)),
                pl.BlockSpec((9, HW), lambda b: (0, 0)),
            ],
            out_specs=pl.BlockSpec((1, C, HW), lambda b: (b, 0, 0)),
        ),
        compiler_params=pltpu.CompilerParams(dimension_semantics=("parallel",)),
    )(x, k1, b1.reshape(C, 1), k2, b2.reshape(C, 1), masks)


# ----------------------------------------------------------------------------
# Kernel C: (ret + xn) residual + conv1_last (single K=2C matmul) + CALayer
#           + residual with un-normed input, fused
# ----------------------------------------------------------------------------

def _ca_fuse_kernel(ret_ref, xn_ref, o2_ref, f1_ref, wl_ref, bl_ref,
                    wdT_ref, bd_ref, wu_ref, bu_ref, o_ref):
    out1 = ret_ref[0] + xn_ref[0]                                   # NLA residual (f32)
    cat = jnp.concatenate([out1, o2_ref[0]], axis=0)                # (2C, HW)
    y = jnp.dot(wl_ref[...], cat.astype(jnp.bfloat16),
                preferred_element_type=jnp.float32) + bl_ref[...]   # (C, HW)
    pooled = jnp.mean(y, axis=1, keepdims=True)                     # (C, 1)
    hidden = jnp.sum(wdT_ref[...] * pooled, axis=0, keepdims=True) + bd_ref[...]  # (1, Cr)
    hidden = _gelu(hidden)
    scale = jnp.sum(wu_ref[...] * hidden, axis=1, keepdims=True) + bu_ref[...]    # (C, 1)
    scale = jax.nn.sigmoid(scale)
    o_ref[0] = (y * scale + f1_ref[0]).astype(o_ref.dtype)


def ca_fuse_pallas(ret, xn, o2, f1, w_last, b_last, w_downT, b_down, w_up, b_up):
    B, C, HW = ret.shape
    Cr = w_downT.shape[1]
    return pl.pallas_call(
        _ca_fuse_kernel,
        out_shape=jax.ShapeDtypeStruct((B, C, HW), xn.dtype),
        grid_spec=pltpu.PrefetchScalarGridSpec(
            num_scalar_prefetch=0,
            grid=(B,),
            in_specs=[
                pl.BlockSpec((1, C, HW), lambda b: (b, 0, 0)),   # ret (NLA output, CHW)
                pl.BlockSpec((1, C, HW), lambda b: (b, 0, 0)),   # xn  (normed input)
                pl.BlockSpec((1, C, HW), lambda b: (b, 0, 0)),   # out2 (conv_local)
                pl.BlockSpec((1, C, HW), lambda b: (b, 0, 0)),   # f1 (residual)
                pl.BlockSpec((C, 2 * C), lambda b: (0, 0)),
                pl.BlockSpec((C, 1), lambda b: (0, 0)),
                pl.BlockSpec((C, Cr), lambda b: (0, 0)),
                pl.BlockSpec((1, Cr), lambda b: (0, 0)),
                pl.BlockSpec((C, Cr), lambda b: (0, 0)),
                pl.BlockSpec((C, 1), lambda b: (0, 0)),
            ],
            out_specs=pl.BlockSpec((1, C, HW), lambda b: (b, 0, 0)),
        ),
        compiler_params=pltpu.CompilerParams(dimension_semantics=("parallel",)),
    )(ret, xn, o2, f1, w_last, b_last.reshape(C, 1),
      w_downT, b_down.reshape(1, Cr), w_up, b_up.reshape(C, 1))


# ----------------------------------------------------------------------------
# Kernel D: norm2 + GDFN (single project_in matmul, dwconv3x3, gated GELU,
#           project_out) + residual, fused
# ----------------------------------------------------------------------------

def _norm_gdfn_kernel(x_ref, lw_ref, lb_ref, wi_ref, k_ref, wo_ref, m_ref, o_ref,
                      *, W, hp, eps):
    ot = x_ref[0]                                                  # (C, HW) out_temp
    on = _layernorm_cols(ot, lw_ref[...], lb_ref[...], eps)        # norm2 fused
    t = jnp.dot(wi_ref[...], on.astype(jnp.bfloat16),
                preferred_element_type=jnp.float32)                # (2*hp, HW)
    d = _dwconv_flat(t, k_ref[...], m_ref[...], W)                 # depthwise 3x3
    gate = _gelu(d[:hp]) * d[hp:]                                  # 8-aligned chunk split
    out = jnp.dot(wo_ref[...], gate.astype(jnp.bfloat16),
                  preferred_element_type=jnp.float32)
    o_ref[0] = (out + ot).astype(o_ref.dtype)


def norm_gdfn_pallas(x, lw, lb, w_in, k_dw, w_out, masks, W, eps=1e-6):
    B, C, HW = x.shape
    hp = w_out.shape[1]                    # padded hidden dim (multiple of 8)
    kern = functools.partial(_norm_gdfn_kernel, W=W, hp=hp, eps=eps)
    return pl.pallas_call(
        kern,
        out_shape=jax.ShapeDtypeStruct((B, C, HW), x.dtype),
        grid_spec=pltpu.PrefetchScalarGridSpec(
            num_scalar_prefetch=0,
            grid=(B,),
            in_specs=[
                pl.BlockSpec((1, C, HW), lambda b: (b, 0, 0)),
                pl.BlockSpec((C, 1), lambda b: (0, 0)),
                pl.BlockSpec((C, 1), lambda b: (0, 0)),
                pl.BlockSpec((2 * hp, C), lambda b: (0, 0)),
                pl.BlockSpec((2 * hp, 9), lambda b: (0, 0)),
                pl.BlockSpec((C, hp), lambda b: (0, 0)),
                pl.BlockSpec((9, HW), lambda b: (0, 0)),
            ],
            out_specs=pl.BlockSpec((1, C, HW), lambda b: (b, 0, 0)),
        ),
        compiler_params=pltpu.CompilerParams(dimension_semantics=("parallel",)),
    )(x, lw.reshape(C, 1), lb.reshape(C, 1), w_in, k_dw, w_out, masks)


# ----------------------------------------------------------------------------
# NonLocalSparseAttention bucketing glue (data-dependent: stays in plain JAX)
# ----------------------------------------------------------------------------
# TODO(synk): LSH argsort/gather bucketing is data-dependent and left to XLA.

def batched_index_select(values, indices):
    idx = jnp.broadcast_to(indices[:, :, None], indices.shape + (values.shape[-1],))
    return jnp.take_along_axis(values, idx, axis=1)


def nla_attention(x_embed, y_embed, rotations, n_hashes, chunk_size):
    # x_embed: (N, L, Cm), y_embed: (N, L, Cy), rotations: (1, Cm, n_hashes, hb//2)
    N, L, Cm = x_embed.shape
    Cy = y_embed.shape[-1]
    hash_buckets = min(L // chunk_size + (L // chunk_size) % 2, 128)
    assert rotations.shape[-1] == hash_buckets // 2

    rot = jnp.broadcast_to(rotations, (N,) + rotations.shape[1:])
    rotated = jnp.einsum('btf,bfhi->bhti', x_embed, rot)
    rotated = jnp.concatenate([rotated, -rotated], axis=-1)      # (N, h, L, hb)
    hash_codes = jnp.argmax(rotated, axis=-1)                    # (N, h, L)
    offsets = (jnp.arange(n_hashes) * hash_buckets).reshape(1, -1, 1)
    hash_codes = (hash_codes + offsets).reshape(N, -1)

    indices = jnp.argsort(hash_codes, axis=-1)
    undo_sort = jnp.argsort(indices, axis=-1)
    mod_indices = indices % L

    x_sorted = batched_index_select(x_embed, mod_indices)        # (N, h*L, Cm)
    y_sorted = batched_index_select(y_embed, mod_indices)        # (N, h*L, Cy)

    padding = chunk_size - L % chunk_size if L % chunk_size != 0 else 0
    x_b = x_sorted.reshape(N, n_hashes, L, Cm)
    y_b = y_sorted.reshape(N, n_hashes, L, Cy)
    if padding:
        x_b = jnp.concatenate([x_b, x_b[:, :, -padding:, :]], axis=2)
        y_b = jnp.concatenate([y_b, y_b[:, :, -padding:, :]], axis=2)
    n_chunks = x_b.shape[2] // chunk_size
    x_b = x_b.reshape(N, n_hashes, n_chunks, chunk_size, Cm)
    y_b = y_b.reshape(N, n_hashes, n_chunks, chunk_size, Cy)

    norm = jnp.sqrt(jnp.sum(x_b * x_b, axis=-1, keepdims=True))
    x_match = x_b / jnp.maximum(norm, 5e-5)

    def add_adjacent(t):
        back = jnp.concatenate([t[:, :, -1:], t[:, :, :-1]], axis=2)
        fwd = jnp.concatenate([t[:, :, 1:], t[:, :, :1]], axis=2)
        return jnp.concatenate([t, back, fwd], axis=3)

    x_match = add_adjacent(x_match)
    y_adj = add_adjacent(y_b)

    raw_score = jnp.einsum('bhkie,bhkje->bhkij', x_b, x_match)
    bucket_score = jax.nn.logsumexp(raw_score, axis=-1, keepdims=True)
    score = jnp.exp(raw_score - bucket_score)
    bucket_score = bucket_score.reshape(N, n_hashes, -1)

    ret = jnp.einsum('bukij,bukje->bukie', score, y_adj)
    ret = ret.reshape(N, n_hashes, -1, Cy)
    if padding:
        ret = ret[:, :, :-padding, :]
        bucket_score = bucket_score[:, :, :-padding]
    ret = ret.reshape(N, -1, Cy)
    bucket_score = bucket_score.reshape(N, -1)

    ret = batched_index_select(ret, undo_sort)
    bucket_score = jnp.take_along_axis(bucket_score, undo_sort, axis=1)
    ret = ret.reshape(N, n_hashes, L, Cy)
    bucket_score = bucket_score.reshape(N, n_hashes, L, 1)
    probs = jax.nn.softmax(bucket_score, axis=1)
    return jnp.sum(ret * probs, axis=1)                          # (N, L, Cy)


# ----------------------------------------------------------------------------
# Parameters & full CRB_Layer forward
# ----------------------------------------------------------------------------

def init_raw_params(key, C):
    Cm, Cr = C // 4, C // 16
    hdim = int(C * 2.66)
    ks = iter(jax.random.split(key, 32))

    def nrm(shape, scale):
        return scale * jax.random.normal(next(ks), shape, jnp.float32)

    return {
        "norm1_w": 1.0 + 0.1 * jax.random.normal(next(ks), (C,), jnp.float32),
        "norm1_b": 0.1 * jax.random.normal(next(ks), (C,), jnp.float32),
        "norm2_w": 1.0 + 0.1 * jax.random.normal(next(ks), (C,), jnp.float32),
        "norm2_b": 0.1 * jax.random.normal(next(ks), (C,), jnp.float32),
        "match_w": nrm((Cm, C, 3, 3), (9 * C) ** -0.5),
        "match_b": nrm((Cm,), 0.05),
        "assembly_w": nrm((C, C, 1, 1), C ** -0.5),
        "assembly_b": nrm((C,), 0.05),
        "local1_w": nrm((C, 1, 3, 3), 1.0 / 3.0),
        "local1_b": nrm((C,), 0.05),
        "local2_w": nrm((C, 1, 3, 3), 1.0 / 3.0),
        "local2_b": nrm((C,), 0.05),
        "last_w": nrm((C, 2 * C, 1, 1), (2 * C) ** -0.5),
        "last_b": nrm((C,), 0.05),
        "ca_d_w": nrm((Cr, C, 1, 1), C ** -0.5),
        "ca_d_b": nrm((Cr,), 0.05),
        "ca_u_w": nrm((C, Cr, 1, 1), Cr ** -0.5),
        "ca_u_b": nrm((C,), 0.05),
        "gdfn_in_w": nrm((2 * hdim, C, 1, 1), C ** -0.5),
        "gdfn_dw_w": nrm((2 * hdim, 1, 3, 3), 1.0 / 3.0),
        "gdfn_out_w": nrm((C, hdim, 1, 1), hdim ** -0.5),
    }


def prepare_kernel_params(raw):
    """Flatten conv weights to matmul layout; pad GDFN hidden dim to 8; bf16 MXU weights."""
    C = raw["assembly_w"].shape[0]
    Cm = raw["match_w"].shape[0]
    Cr = raw["ca_d_w"].shape[0]
    hdim = raw["gdfn_out_w"].shape[1]
    hp = ((hdim + 7) // 8) * 8
    bf = jnp.bfloat16

    p = dict(raw)
    # im2col layout: column index = tap*C + c, tap order == _TAPS
    p["match_w_mat"] = raw["match_w"].transpose(0, 2, 3, 1).reshape(Cm, 9 * C).astype(bf)
    p["assembly_w_mat"] = raw["assembly_w"].reshape(C, C).astype(bf)
    p["local1_k"] = raw["local1_w"].reshape(C, 9)
    p["local2_k"] = raw["local2_w"].reshape(C, 9)
    p["last_w_mat"] = raw["last_w"].reshape(C, 2 * C).astype(bf)
    p["ca_d_matT"] = raw["ca_d_w"].reshape(Cr, C).T                 # (C, Cr) f32
    p["ca_u_mat"] = raw["ca_u_w"].reshape(C, Cr)                    # (C, Cr) f32

    # GDFN weights, zero-padded hdim -> hp (padded rows/cols are exactly zero,
    # so the output is bit-identical to the unpadded computation).
    w_in = raw["gdfn_in_w"].reshape(2 * hdim, C)
    w_in_pad = jnp.zeros((2 * hp, C), jnp.float32)
    w_in_pad = w_in_pad.at[:hdim].set(w_in[:hdim]).at[hp:hp + hdim].set(w_in[hdim:])
    p["gdfn_in_mat"] = w_in_pad.astype(bf)

    k_dw = raw["gdfn_dw_w"].reshape(2 * hdim, 9)
    k_pad = jnp.zeros((2 * hp, 9), jnp.float32)
    p["gdfn_dw_k"] = k_pad.at[:hdim].set(k_dw[:hdim]).at[hp:hp + hdim].set(k_dw[hdim:])

    w_out = raw["gdfn_out_w"].reshape(C, hdim)
    p["gdfn_out_mat"] = jnp.zeros((C, hp), jnp.float32).at[:, :hdim].set(w_out).astype(bf)
    return p


def crb_layer_forward(x, p, rotations, n_hashes=4, chunk_size=144):
    B, C, H, W = x.shape
    HW = H * W
    masks = make_shift_masks(H, W)
    xf = x.reshape(B, C, HW)

    # Kernel A: norm1 + NLA embeddings (xn is emitted for the other branches)
    xn, xe, ye = norm_nla_embed_pallas(
        xf, p["norm1_w"], p["norm1_b"], p["match_w_mat"], p["match_b"],
        p["assembly_w_mat"], p["assembly_b"], masks, W)

    # data-dependent LSH attention (plain JAX/XLA)
    ret = nla_attention(jnp.swapaxes(xe, 1, 2), jnp.swapaxes(ye, 1, 2),
                        rotations, n_hashes, chunk_size)
    ret_chw = jnp.swapaxes(ret, 1, 2)   # (B, C, HW); residual add happens in ca_fuse

    # Kernel B: local depthwise conv branch
    out2 = conv_local_pallas(xn, p["local1_k"], p["local1_b"],
                             p["local2_k"], p["local2_b"], masks, W)

    # Kernel C: (ret + xn) + conv1_last + channel attention + residual with f1 = x
    out_temp = ca_fuse_pallas(ret_chw, xn, out2, xf, p["last_w_mat"], p["last_b"],
                              p["ca_d_matT"], p["ca_d_b"], p["ca_u_mat"], p["ca_u_b"])

    # Kernel D: norm2 + GDFN + residual
    y = norm_gdfn_pallas(out_temp, p["norm2_w"], p["norm2_b"], p["gdfn_in_mat"],
                         p["gdfn_dw_k"], p["gdfn_out_mat"], masks, W)
    return y.reshape(B, C, H, W)


# ----------------------------------------------------------------------------
# Pure-JAX references for per-kernel correctness checks
# ----------------------------------------------------------------------------

def ref_conv2d(x, w, b=None, groups=1, padding=0):
    out = lax.conv_general_dilated(
        x, w, window_strides=(1, 1),
        padding=((padding, padding), (padding, padding)),
        dimension_numbers=("NCHW", "OIHW", "NCHW"),
        feature_group_count=groups)
    if b is not None:
        out = out + b.reshape(1, -1, 1, 1)
    return out


def ref_layernorm2d(x, w, b, eps=1e-6):
    mu = jnp.mean(x, axis=1, keepdims=True)
    var = jnp.mean((x - mu) ** 2, axis=1, keepdims=True)
    y = (x - mu) / jnp.sqrt(var + eps)
    return w.reshape(1, -1, 1, 1) * y + b.reshape(1, -1, 1, 1)


def ref_conv_local(x4, raw):
    c = x4.shape[1]
    t = ref_conv2d(x4, raw["local1_w"], raw["local1_b"], groups=c, padding=1)
    t = _gelu(t)
    return ref_conv2d(t, raw["local2_w"], raw["local2_b"], groups=c, padding=1)


def ref_ca_fuse(ret4, xn4, o24, f14, raw):
    out1 = ret4 + xn4
    cat = jnp.concatenate([out1, o24], axis=1)
    y = ref_conv2d(cat, raw["last_w"], raw["last_b"])
    pooled = jnp.mean(y, axis=(2, 3), keepdims=True)
    h = _gelu(ref_conv2d(pooled, raw["ca_d_w"], raw["ca_d_b"]))
    s = jax.nn.sigmoid(ref_conv2d(h, raw["ca_u_w"], raw["ca_u_b"]))
    return y * s + f14


def ref_norm_gdfn(x4, raw):
    hdim = raw["gdfn_out_w"].shape[1]
    on = ref_layernorm2d(x4, raw["norm2_w"], raw["norm2_b"])
    t = ref_conv2d(on, raw["gdfn_in_w"])
    t = ref_conv2d(t, raw["gdfn_dw_w"], groups=t.shape[1], padding=1)
    gate = _gelu(t[:, :hdim]) * t[:, hdim:]
    return ref_conv2d(gate, raw["gdfn_out_w"]) + x4


# ----------------------------------------------------------------------------
# main
# ----------------------------------------------------------------------------

if __name__ == "__main__":
    key = jax.random.PRNGKey(0)
    k_x, k_p, k_rot, k_r1, k_r2, k_r3, k_r4, k_g = jax.random.split(key, 8)

    B, C, H, W = 2, 64, 16, 16
    HW = H * W
    n_hashes, chunk_size = 4, 144

    x = jax.random.normal(k_x, (B, C, H, W), dtype=jnp.float32)
    raw = init_raw_params(k_p, C)
    prm = prepare_kernel_params(raw)
    Cm = C // 4
    hash_buckets = min(HW // chunk_size + (HW // chunk_size) % 2, 128)
    rotations = jax.random.normal(k_rot, (1, Cm, n_hashes, hash_buckets // 2),
                                  dtype=jnp.float32)

    masks = make_shift_masks(H, W)
    TOL = dict(atol=2e-2, rtol=2e-2)        # f32-only paths
    TOL_BF16 = dict(atol=5e-2, rtol=5e-2)   # bf16 MXU operands vs f32 reference

    xf = x.reshape(B, C, HW)

    # ---- Kernel A: norm1 + conv_match + conv_assembly ----
    xn_p, xe_p, ye_p = norm_nla_embed_pallas(
        xf, raw["norm1_w"], raw["norm1_b"], prm["match_w_mat"], raw["match_b"],
        prm["assembly_w_mat"], raw["assembly_b"], masks, W)
    ln_r = ref_layernorm2d(x, raw["norm1_w"], raw["norm1_b"])
    xe_r = ref_conv2d(ln_r, raw["match_w"], raw["match_b"], padding=1)
    ye_r = ref_conv2d(ln_r, raw["assembly_w"], raw["assembly_b"])
    assert bool(jnp.allclose(xn_p.reshape(B, C, H, W), ln_r, **TOL)), "norm1 mismatch"
    assert bool(jnp.allclose(xe_p.reshape(B, Cm, H, W), xe_r, **TOL_BF16)), "conv_match mismatch"
    assert bool(jnp.allclose(ye_p.reshape(B, C, H, W), ye_r, **TOL_BF16)), "conv_assembly mismatch"

    # ---- Kernel B: conv_local ----
    cl_p = conv_local_pallas(xn_p, prm["local1_k"], raw["local1_b"],
                             prm["local2_k"], raw["local2_b"], masks, W)
    cl_r = ref_conv_local(ln_r, raw)
    assert bool(jnp.allclose(cl_p.reshape(B, C, H, W), cl_r, **TOL)), "conv_local mismatch"

    # ---- Kernel C: (ret + xn) + conv1_last + CA + residual ----
    a_ret = jax.random.normal(k_r1, (B, C, HW), jnp.float32)
    a_xn = jax.random.normal(k_r2, (B, C, HW), jnp.float32)
    a_o2 = jax.random.normal(k_r3, (B, C, HW), jnp.float32)
    a_f1 = jax.random.normal(k_r4, (B, C, HW), jnp.float32)
    ca_p = ca_fuse_pallas(a_ret, a_xn, a_o2, a_f1, prm["last_w_mat"], raw["last_b"],
                          prm["ca_d_matT"], raw["ca_d_b"], prm["ca_u_mat"], raw["ca_u_b"])
    ca_r = ref_ca_fuse(a_ret.reshape(B, C, H, W), a_xn.reshape(B, C, H, W),
                       a_o2.reshape(B, C, H, W), a_f1.reshape(B, C, H, W), raw)
    assert bool(jnp.allclose(ca_p.reshape(B, C, H, W), ca_r, **TOL_BF16)), "conv1_last/CA mismatch"

    # ---- Kernel D: norm2 + GDFN + residual ----
    g = jax.random.normal(k_g, (B, C, HW), jnp.float32)
    gd_p = norm_gdfn_pallas(g, raw["norm2_w"], raw["norm2_b"], prm["gdfn_in_mat"],
                            prm["gdfn_dw_k"], prm["gdfn_out_mat"], masks, W)
    gd_r = ref_norm_gdfn(g.reshape(B, C, H, W), raw)
    assert bool(jnp.allclose(gd_p.reshape(B, C, H, W), gd_r, **TOL_BF16)), "norm2/GDFN mismatch"

    # ---- full CRB_Layer forward (Pallas-accelerated pipeline) ----
    out = jax.block_until_ready(jax.jit(crb_layer_forward)(x, prm, rotations))
    assert out.shape == (B, C, H, W), out.shape
    assert bool(jnp.all(jnp.isfinite(out))), "non-finite output"

    print("KERNEL_OK")
</pallas_src>

<mosaic_0001>
module attributes {stable_mosaic.version = 11 : i64} {
  func.func @_norm_nla_embed_kernel(%arg0: i32, %arg1: memref<1x64x256xf32, #tpu.memory_space<vmem>>, %arg2: memref<64x1xf32, #tpu.memory_space<vmem>>, %arg3: memref<64x1xf32, #tpu.memory_space<vmem>>, %arg4: memref<16x576xbf16, #tpu.memory_space<vmem>>, %arg5: memref<16x1xf32, #tpu.memory_space<vmem>>, %arg6: memref<64x64xbf16, #tpu.memory_space<vmem>>, %arg7: memref<64x1xf32, #tpu.memory_space<vmem>>, %arg8: memref<9x256xf32, #tpu.memory_space<vmem>>, %arg9: memref<1x64x256xf32, #tpu.memory_space<vmem>>, %arg10: memref<1x16x256xf32, #tpu.memory_space<vmem>>, %arg11: memref<1x64x256xf32, #tpu.memory_space<vmem>>) attributes {dimension_semantics = [#tpu.dimension_semantics<parallel>], iteration_bounds = array<i64: 2>, scalar_prefetch = 0 : i64, scratch_operands = 0 : i64, tpu.core_type = #tpu.core_type<tc>, window_params = [{transform_indices = @transform_0, window_bounds = array<i64: 1, 64, 256>}, {pipeline_mode = #tpu.pipeline_mode<synchronous>, transform_indices = @transform_1, window_bounds = array<i64: 64, 1>}, {pipeline_mode = #tpu.pipeline_mode<synchronous>, transform_indices = @transform_2, window_bounds = array<i64: 64, 1>}, {pipeline_mode = #tpu.pipeline_mode<synchronous>, transform_indices = @transform_3, window_bounds = array<i64: 16, 576>}, {pipeline_mode = #tpu.pipeline_mode<synchronous>, transform_indices = @transform_4, window_bounds = array<i64: 16, 1>}, {pipeline_mode = #tpu.pipeline_mode<synchronous>, transform_indices = @transform_5, window_bounds = array<i64: 64, 64>}, {pipeline_mode = #tpu.pipeline_mode<synchronous>, transform_indices = @transform_6, window_bounds = array<i64: 64, 1>}, {pipeline_mode = #tpu.pipeline_mode<synchronous>, transform_indices = @transform_7, window_bounds = array<i64: 9, 256>}, {transform_indices = @transform_8, window_bounds = array<i64: 1, 64, 256>}, {transform_indices = @transform_9, window_bounds = array<i64: 1, 16, 256>}, {transform_indices = @transform_10, window_bounds = array<i64: 1, 64, 256>}]} {
    %c0 = arith.constant 0 : index
    %c0_0 = arith.constant 0 : index
    %c0_1 = arith.constant 0 : index
    %0 = vector.load %arg1[%c0, %c0_0, %c0_1] : memref<1x64x256xf32, #tpu.memory_space<vmem>>, vector<1x64x256xf32>
    %1 = vector.shape_cast %0 : vector<1x64x256xf32> to vector<64x256xf32>
    %c0_2 = arith.constant 0 : index
    %c0_3 = arith.constant 0 : index
    %2 = vector.load %arg2[%c0_2, %c0_3] : memref<64x1xf32, #tpu.memory_space<vmem>>, vector<64x1xf32>
    %c0_4 = arith.constant 0 : index
    %c0_5 = arith.constant 0 : index
    %3 = vector.load %arg3[%c0_4, %c0_5] : memref<64x1xf32, #tpu.memory_space<vmem>>, vector<64x1xf32>
    %cst = arith.constant dense<0.000000e+00> : vector<256xf32>
    %4 = vector.multi_reduction <add>, %1, %cst [0] : vector<64x256xf32> to vector<256xf32>
    %5 = vector.shape_cast %4 : vector<256xf32> to vector<1x256xf32>
    %cst_6 = arith.constant 6.400000e+01 : f32
    %6 = vector.broadcast %cst_6 : f32 to vector<1x256xf32>
    %7 = arith.divf %5, %6 : vector<1x256xf32>
    %8 = vector.broadcast %7 : vector<1x256xf32> to vector<64x256xf32>
    %9 = arith.subf %1, %8 : vector<64x256xf32>
    %10 = arith.mulf %9, %9 : vector<64x256xf32>
    %cst_7 = arith.constant dense<0.000000e+00> : vector<256xf32>
    %11 = vector.multi_reduction <add>, %10, %cst_7 [0] : vector<64x256xf32> to vector<256xf32>
    %12 = vector.shape_cast %11 : vector<256xf32> to vector<1x256xf32>
    %cst_8 = arith.constant 6.400000e+01 : f32
    %13 = vector.broadcast %cst_8 : f32 to vector<1x256xf32>
    %14 = arith.divf %12, %13 : vector<1x256xf32>
    %cst_9 = arith.constant 9.99999997E-7 : f32
    %15 = vector.broadcast %cst_9 : f32 to vector<1x256xf32>
    %16 = arith.addf %14, %15 : vector<1x256xf32>
    %17 = math.rsqrt %16 : vector<1x256xf32>
    %18 = vector.broadcast %17 : vector<1x256xf32> to vector<64x256xf32>
    %19 = arith.mulf %9, %18 : vector<64x256xf32>
    %20 = vector.broadcast %2 : vector<64x1xf32> to vector<64x256xf32>
    %21 = arith.mulf %20, %19 : vector<64x256xf32>
    %22 = vector.broadcast %3 : vector<64x1xf32> to vector<64x256xf32>
    %23 = arith.addf %21, %22 : vector<64x256xf32>
    %c0_10 = arith.constant 0 : index
    %c0_11 = arith.constant 0 : index
    %c0_12 = arith.constant 0 : index
    %24 = vector.load %arg9[%c0_10, %c0_11, %c0_12] : memref<1x64x256xf32, #tpu.memory_space<vmem>>, vector<1x64x256xf32>
    %25 = vector.shape_cast %24 : vector<1x64x256xf32> to vector<64x256xf32>
    %26 = vector.shape_cast %23 : vector<64x256xf32> to vector<1x64x256xf32>
    tpu.vector_store %arg9[%c0_10, %c0_11, %c0_12], %26 {strides = array<i32>} : memref<1x64x256xf32, #tpu.memory_space<vmem>>, vector<1x64x256xf32>,
    %c0_13 = arith.constant 0 : index
    %c0_14 = arith.constant 0 : index
    %27 = vector.load %arg8[%c0_13, %c0_14] : memref<9x256xf32, #tpu.memory_space<vmem>>, vector<9x256xf32>
    %28 = vector.extract_strided_slice %23 {offsets = [0, 239], sizes = [64, 17], strides = [1, 1]} : vector<64x256xf32> to vector<64x17xf32>
    %29 = vector.extract_strided_slice %23 {offsets = [0, 0], sizes = [64, 239], strides = [1, 1]} : vector<64x256xf32> to vector<64x239xf32>
    %30 = tpu.concatenate %28, %29 in 1 : vector<64x17xf32>, vector<64x239xf32> -> vector<64x256xf32>
    %31 = vector.extract_strided_slice %27 {offsets = [0, 0], sizes = [1, 256], strides = [1, 1]} : vector<9x256xf32> to vector<1x256xf32>
    %32 = vector.broadcast %31 : vector<1x256xf32> to vector<64x256xf32>
    %33 = arith.mulf %30, %32 : vector<64x256xf32>
    %34 = vector.extract_strided_slice %23 {offsets = [0, 240], sizes = [64, 16], strides = [1, 1]} : vector<64x256xf32> to vector<64x16xf32>
    %35 = vector.extract_strided_slice %23 {offsets = [0, 0], sizes = [64, 240], strides = [1, 1]} : vector<64x256xf32> to vector<64x240xf32>
    %36 = tpu.concatenate %34, %35 in 1 : vector<64x16xf32>, vector<64x240xf32> -> vector<64x256xf32>
    %37 = vector.extract_strided_slice %27 {offsets = [1, 0], sizes = [1, 256], strides = [1, 1]} : vector<9x256xf32> to vector<1x256xf32>
    %38 = vector.broadcast %37 : vector<1x256xf32> to vector<64x256xf32>
    %39 = arith.mulf %36, %38 : vector<64x256xf32>
    %40 = vector.extract_strided_slice %23 {offsets = [0, 241], sizes = [64, 15], strides = [1, 1]} : vector<64x256xf32> to vector<64x15xf32>
    %41 = vector.extract_strided_slice %23 {offsets = [0, 0], sizes = [64, 241], strides = [1, 1]} : vector<64x256xf32> to vector<64x241xf32>
    %42 = tpu.concatenate %40, %41 in 1 : vector<64x15xf32>, vector<64x241xf32> -> vector<64x256xf32>
    %43 = vector.extract_strided_slice %27 {offsets = [2, 0], sizes = [1, 256], strides = [1, 1]} : vector<9x256xf32> to vector<1x256xf32>
    %44 = vector.broadcast %43 : vector<1x256xf32> to vector<64x256xf32>
    %45 = arith.mulf %42, %44 : vector<64x256xf32>
    %46 = vector.extract_strided_slice %23 {offsets = [0, 255], sizes = [64, 1], strides = [1, 1]} : vector<64x256xf32> to vector<64x1xf32>
    %47 = vector.extract_strided_slice %23 {offsets = [0, 0], sizes = [64, 255], strides = [1, 1]} : vector<64x256xf32> to vector<64x255xf32>
    %48 = tpu.concatenate %46, %47 in 1 : vector<64x1xf32>, vector<64x255xf32> -> vector<64x256xf32>
    %49 = vector.extract_strided_slice %27 {offsets = [3, 0], sizes = [1, 256], strides = [1, 1]} : vector<9x256xf32> to vector<1x256xf32>
    %50 = vector.broadcast %49 : vector<1x256xf32> to vector<64x256xf32>
    %51 = arith.mulf %48, %50 : vector<64x256xf32>
    %52 = vector.extract_strided_slice %23 {offsets = [0, 1], sizes = [64, 255], strides = [1, 1]} : vector<64x256xf32> to vector<64x255xf32>
    %53 = vector.extract_strided_slice %23 {offsets = [0, 0], sizes = [64, 1], strides = [1, 1]} : vector<64x256xf32> to vector<64x1xf32>
    %54 = tpu.concatenate %52, %53 in 1 : vector<64x255xf32>, vector<64x1xf32> -> vector<64x256xf32>
    %55 = vector.extract_strided_slice %27 {offsets = [5, 0], sizes = [1, 256], strides = [1, 1]} : vector<9x256xf32> to vector<1x256xf32>
    %56 = vector.broadcast %55 : vector<1x256xf32> to vector<64x256xf32>
    %57 = arith.mulf %54, %56 : vector<64x256xf32>
    %58 = vector.extract_strided_slice %23 {offsets = [0, 15], sizes = [64, 241], strides = [1, 1]} : vector<64x256xf32> to vector<64x241xf32>
    %59 = vector.extract_strided_slice %23 {offsets = [0, 0], sizes = [64, 15], strides = [1, 1]} : vector<64x256xf32> to vector<64x15xf32>
    %60 = tpu.concatenate %58, %59 in 1 : vector<64x241xf32>, vector<64x15xf32> -> vector<64x256xf32>
    %61 = vector.extract_strided_slice %27 {offsets = [6, 0], sizes = [1, 256], strides = [1, 1]} : vector<9x256xf32> to vector<1x256xf32>
    %62 = vector.broadcast %61 : vector<1x256xf32> to vector<64x256xf32>
    %63 = arith.mulf %60, %62 : vector<64x256xf32>
    %64 = vector.extract_strided_slice %23 {offsets = [0, 16], sizes = [64, 240], strides = [1, 1]} : vector<64x256xf32> to vector<64x240xf32>
    %65 = vector.extract_strided_slice %23 {offsets = [0, 0], sizes = [64, 16], strides = [1, 1]} : vector<64x256xf32> to vector<64x16xf32>
    %66 = tpu.concatenate %64, %65 in 1 : vector<64x240xf32>, vector<64x16xf32> -> vector<64x256xf32>
    %67 = vector.extract_strided_slice %27 {offsets = [7, 0], sizes = [1, 256], strides = [1, 1]} : vector<9x256xf32> to vector<1x256xf32>
    %68 = vector.broadcast %67 : vector<1x256xf32> to vector<64x256xf32>
    %69 = arith.mulf %66, %68 : vector<64x256xf32>
    %70 = vector.extract_strided_slice %23 {offsets = [0, 17], sizes = [64, 239], strides = [1, 1]} : vector<64x256xf32> to vector<64x239xf32>
    %71 = vector.extract_strided_slice %23 {offsets = [0, 0], sizes = [64, 17], strides = [1, 1]} : vector<64x256xf32> to vector<64x17xf32>
    %72 = tpu.concatenate %70, %71 in 1 : vector<64x239xf32>, vector<64x17xf32> -> vector<64x256xf32>
    %73 = vector.extract_strided_slice %27 {offsets = [8, 0], sizes = [1, 256], strides = [1, 1]} : vector<9x256xf32> to vector<1x256xf32>
    %74 = vector.broadcast %73 : vector<1x256xf32> to vector<64x256xf32>
    %75 = arith.mulf %72, %74 : vector<64x256xf32>
    %76 = tpu.concatenate %33, %39, %45, %51, %23, %57, %63, %69, %75 in 0 : vector<64x256xf32>, vector<64x256xf32>, vector<64x256xf32>, vector<64x256xf32>, vector<64x256xf32>, vector<64x256xf32>, vector<64x256xf32>, vector<64x256xf32>, vector<64x256xf32> -> vector<576x256xf32>
    %77 = arith.truncf %76 : vector<576x256xf32> to vector<576x256xbf16>
    %78 = arith.truncf %23 : vector<64x256xf32> to vector<64x256xbf16>
    %c0_15 = arith.constant 0 : index
    %c0_16 = arith.constant 0 : index
    %79 = vector.load %arg4[%c0_15, %c0_16] : memref<16x576xbf16, #tpu.memory_space<vmem>>, vector<16x576xbf16>
    %cst_17 = arith.constant dense<0.000000e+00> : vector<16x256xf32>
    %80 = tpu.matmul %79, %77, %cst_17 {dimension_numbers = #tpu.dot_dimension_numbers<[1], [0], [0], [1], [0, 0, 1, 1], [], []>} : vector<16x576xbf16>, vector<576x256xbf16>, vector<16x256xf32> -> vector<16x256xf32>
    %c0_18 = arith.constant 0 : index
    %c0_19 = arith.constant 0 : index
    %81 = vector.load %arg5[%c0_18, %c0_19] : memref<16x1xf32, #tpu.memory_space<vmem>>, vector<16x1xf32>
    %82 = vector.broadcast %81 : vector<16x1xf32> to vector<16x256xf32>
    %83 = arith.addf %80, %82 : vector<16x256xf32>
    %c0_20 = arith.constant 0 : index
    %c0_21 = arith.constant 0 : index
    %84 = vector.load %arg6[%c0_20, %c0_21] : memref<64x64xbf16, #tpu.memory_space<vmem>>, vector<64x64xbf16>
    %cst_22 = arith.constant dense<0.000000e+00> : vector<64x256xf32>
    %85 = tpu.matmul %84, %78, %cst_22 {dimension_numbers = #tpu.dot_dimension_numbers<[1], [0], [0], [1], [0, 0, 1, 1], [], []>} : vector<64x64xbf16>, vector<64x256xbf16>, vector<64x256xf32> -> vector<64x256xf32>
    %c0_23 = arith.constant 0 : index
    %c0_24 = arith.constant 0 : index
    %86 = vector.load %arg7[%c0_23, %c0_24] : memref<64x1xf32, #tpu.memory_space<vmem>>, vector<64x1xf32>
    %87 = vector.broadcast %86 : vector<64x1xf32> to vector<64x256xf32>
    %88 = arith.addf %85, %87 : vector<64x256xf32>
    %c0_25 = arith.constant 0 : index
    %c0_26 = arith.constant 0 : index
    %c0_27 = arith.constant 0 : index
    %89 = vector.load %arg10[%c0_25, %c0_26, %c0_27] : memref<1x16x256xf32, #tpu.memory_space<vmem>>, vector<1x16x256xf32>
    %90 = vector.shape_cast %89 : vector<1x16x256xf32> to vector<16x256xf32>
    %91 = vector.shape_cast %83 : vector<16x256xf32> to vector<1x16x256xf32>
    tpu.vector_store %arg10[%c0_25, %c0_26, %c0_27], %91 {strides = array<i32>} : memref<1x16x256xf32, #tpu.memory_space<vmem>>, vector<1x16x256xf32>,
    %c0_28 = arith.constant 0 : index
    %c0_29 = arith.constant 0 : index
    %c0_30 = arith.constant 0 : index
    %92 = vector.load %arg11[%c0_28, %c0_29, %c0_30] : memref<1x64x256xf32, #tpu.memory_space<vmem>>, vector<1x64x256xf32>
    %93 = vector.shape_cast %92 : vector<1x64x256xf32> to vector<64x256xf32>
    %94 = vector.shape_cast %88 : vector<64x256xf32> to vector<1x64x256xf32>
    tpu.vector_store %arg11[%c0_28, %c0_29, %c0_30], %94 {strides = array<i32>} : memref<1x64x256xf32, #tpu.memory_space<vmem>>, vector<1x64x256xf32>,
    return
  }
  func.func @transform_0(%arg0: i32) -> (i32, i32, i32) {
    %c0_i32 = arith.constant 0 : i32
    %c0_i32_0 = arith.constant 0 : i32
    %c0_i32_1 = arith.constant 0 : i32
    return %arg0, %c0_i32, %c0_i32_0 : i32, i32, i32
  }
  func.func @transform_1(%arg0: i32) -> (i32, i32) {
    %c0_i32 = arith.constant 0 : i32
    %c0_i32_0 = arith.constant 0 : i32
    %c0_i32_1 = arith.constant 0 : i32
    return %c0_i32, %c0_i32_0 : i32, i32
  }
  func.func @transform_2(%arg0: i32) -> (i32, i32) {
    %c0_i32 = arith.constant 0 : i32
    %c0_i32_0 = arith.constant 0 : i32
    %c0_i32_1 = arith.constant 0 : i32
    return %c0_i32, %c0_i32_0 : i32, i32
  }
  func.func @transform_3(%arg0: i32) -> (i32, i32) {
    %c0_i32 = arith.constant 0 : i32
    %c0_i32_0 = arith.constant 0 : i32
    %c0_i32_1 = arith.constant 0 : i32
    return %c0_i32, %c0_i32_0 : i32, i32
  }
  func.func @transform_4(%arg0: i32) -> (i32, i32) {
    %c0_i32 = arith.constant 0 : i32
    %c0_i32_0 = arith.constant 0 : i32
    %c0_i32_1 = arith.constant 0 : i32
    return %c0_i32, %c0_i32_0 : i32, i32
  }
  func.func @transform_5(%arg0: i32) -> (i32, i32) {
    %c0_i32 = arith.constant 0 : i32
    %c0_i32_0 = arith.constant 0 : i32
    %c0_i32_1 = arith.constant 0 : i32
    return %c0_i32, %c0_i32_0 : i32, i32
  }
  func.func @transform_6(%arg0: i32) -> (i32, i32) {
    %c0_i32 = arith.constant 0 : i32
    %c0_i32_0 = arith.constant 0 : i32
    %c0_i32_1 = arith.constant 0 : i32
    return %c0_i32, %c0_i32_0 : i32, i32
  }
  func.func @transform_7(%arg0: i32) -> (i32, i32) {
    %c0_i32 = arith.constant 0 : i32
    %c0_i32_0 = arith.constant 0 : i32
    %c0_i32_1 = arith.constant 0 : i32
    return %c0_i32, %c0_i32_0 : i32, i32
  }
  func.func @transform_8(%arg0: i32) -> (i32, i32, i32) {
    %c0_i32 = arith.constant 0 : i32
    %c0_i32_0 = arith.constant 0 : i32
    %c0_i32_1 = arith.constant 0 : i32
    return %arg0, %c0_i32, %c0_i32_0 : i32, i32, i32
  }
  func.func @transform_9(%arg0: i32) -> (i32, i32, i32) {
    %c0_i32 = arith.constant 0 : i32
    %c0_i32_0 = arith.constant 0 : i32
    %c0_i32_1 = arith.constant 0 : i32
    return %arg0, %c0_i32, %c0_i32_0 : i32, i32, i32
  }
  func.func @transform_10(%arg0: i32) -> (i32, i32, i32) {
    %c0_i32 = arith.constant 0 : i32
    %c0_i32_0 = arith.constant 0 : i32
    %c0_i32_1 = arith.constant 0 : i32
    return %arg0, %c0_i32, %c0_i32_0 : i32, i32, i32
  }
}

</mosaic_0001>

<bundles_post_ra>
// kernel: tpu_custom_call.1
= control target key start
LH: loop header
LB: loop body
LE: loop exit
PB: predicated region body
PF: predicated region fallthrough
CT: control target
= control target key end

     0   :  { %16 = vsyncpa [#allocation3], 0  ;;  %s3670_s0 = inlined_call_operand.hbm [shape: f32[2,64,256], index: 0, kind: input, shape index: {}]   ;;  %s3671_s1 = inlined_call_operand.vmem [shape: f32[64,1], index: 1, kind: input, shape index: {}]   ;;  %s3672_s2 = inlined_call_operand.vmem [shape: f32[64,1], index: 2, kind: input, shape index: {}]   ;;  %s3673_s3 = inlined_call_operand.vmem [shape: bf16[16,576], index: 3, kind: input, shape index: {}]   ;;  %s3674_s4 = inlined_call_operand.vmem [shape: f32[16,1], index: 4, kind: input, shape index: {}]   ;;  %s3675_s5 = inlined_call_operand.vmem [shape: bf16[64,64], index: 5, kind: input, shape index: {}]   ;;  %s3676_s6 = inlined_call_operand.vmem [shape: f32[64,1], index: 6, kind: input, shape index: {}]   ;;  %s3677_s7 = inlined_call_operand.vmem [shape: f32[9,256], index: 7, kind: input, shape index: {}]   ;;  %s3678_s8 = inlined_call_operand.hbm [shape: f32[2,64,256], index: 8, kind: output, shape index: {0}]   ;;  %s3679_s9 = inlined_call_operand.hbm [shape: f32[2,16,256], index: 9, kind: output, shape index: {1}]   ;;  %s3680_s10 = inlined_call_operand.hbm [shape: f32[2,64,256], index: 10, kind: output, shape index: {2}]  }
   0x1   :  { %18 = vsyncpa [#allocation3 + $0x1], 0 }
   0x2   :  { %19 = vsyncpa [#allocation4], 0 }
   0x3   :  { %21 = vsyncpa [#allocation4 + $0x1], 0 }
   0x4   :  { %22 = vsyncpa [#allocation7], 0 }
   0x5   :  { %24 = vsyncpa [#allocation7 + $0x1], 0  ;;  %s2437_s13 = smov 0   ;;  %s2439_s14 = smov 0  }
   0x6   :  { %s2441_s15 = smov 0   ;;  %s2443_s16 = smov 0  }
   0x7 LB: > { %3690 = sst [smem:[#allocation12_spill]] %s2360_s15  ;;  %s2458_s17 = sadd.s32 4294967295, %s2364_s16   ;;  %s2364_s16 = sphi %s2443_s16, %s3706_s16   ;;  %s2360_s15 = sphi %s2441_s15, %s3708_s15   ;;  %s2356_s14 = sphi %s2439_s14, %s3710_s14   ;;  %s2352_s13 = sphi %s2437_s13, %s3709_s13  }
   0x8   : > { %s3681_s18 = sadd.s32 4294967294, %s2364_s16   ;;  %s2462_s19 = sadd.s32 1, %s2364_s16  }
   0x9   : > { %3691 = sst [smem:[#allocation13_spill]] %s2462_s19  ;;  %s37_s20 = sadd.s32 1, %s2360_s15 }
   0xa   : > { %s34_s21 = ssub.s32 %s2364_s16, %s2462_s19  ;;  %p44_p0 = scmp.ne.s32.totalorder %s2360_s15, %s2356_s14 }
   0xb   : > { %p35_p1 = scmp.eq.s32.totalorder %s34_s21, 0  ;;  %p45_p2 = scmp.eq.s32.totalorder %s2364_s16, 0 }
   0xc   : > { %p50_p3 = scmp.ne.s32.totalorder %s2356_s14, %s2352_s13  ;;  %p51_p4 = scmp.eq.s32.totalorder %s2458_s17, 0 }
   0xd   : > { %s2474_s22 = scalar_select %p35_p1, %s2360_s15, %s37_s20  }
   0xe   : > { %p2476_p5 = por %p45_p2, %p44_p0  ;;  %p2480_p6 = por %p51_p4, %p50_p3 }
   0xf   : > { %3692 = sst [smem:[#allocation14_spill]] %s2474_s22  ;;  %p221_p7 = scmp.eq.s32.totalorder %s2458_s17, 1 }
  0x10   : > { %s3694_s24 = scalar_select %p2480_p6, 1, 0 }
  0x11   : > { %p227_p8 = scmp.eq.s32.totalorder %s3681_s18, 1  ;;  %p2153_p10 = scmp.lt.s32.totalorder %s2364_s16, 2 }
  0x12   : > { %p2489_p11 = por %p221_p7, %p44_p0  ;;  %s320_s27 = sand.u32 1, %s2360_s15  }
  0x13   : > { %p2493_p12 = por %p227_p8, %p50_p3  ;;  %s2119_s28 = sshll.u32 %s2364_s16, 11 }
  0x14   : > { %s3695_s25 = scalar_select %p2489_p11, 1, 0 }
  0x15   : > { %s3696_s26 = scalar_select %p2493_p12, 1, 0 }
  0x16   : > { %s2084_s29 = sshll.u32 %s320_s27, 7  ;;  %s2502_s12 = scalar_lea.hbm %s3670_s0, %s2119_s28 }
  0x17   : > { %s324_s20 = scalar_lea.vmem [#allocation2], %s2084_s29  ;;  %p2506_p13 = pnand %p2153_p10, %p2476_p5 }
  0x18   : > { %s331_s21 = sshll.u32 %s324_s20, 4  ;;  %s2512_s22 = scalar_lea.sflag [#allocation3], %s320_s27  ;;  %s2510_s21 = int_to_ptr.vmem [resolvable:$true] %s331_s21 }
  0x19   : > { %s2216_s15 = scalar_lea.hbm %s2502_s12, 2048  ;;  %p2218_p1 = pneg %p2506_p13 }
  0x1a   : > { %p2217_p0 = scmp.ne.s32.totalorder %s2502_s12, %s2216_s15  ;;  %s2221_s29 = scalar_lea.hbm %s3670_s0, 4096 }
  0x1b   : > { %p2222_p4 = scmp.lt.s32.totalorder %s2502_s12, %s3670_s0  ;;  %p2223_p5 = scmp.lt.s32.totalorder %s2221_s29, %s2216_s15 }
  0x1c   : > { %p2219_p2 = pnand %p2218_p1, %p2217_p0 }
  0x1d   : > { %p2224_p7 = por %p2223_p5, %p2222_p4 }
  0x1e   : > { %p2220_p3 = pneg %p2219_p2 }
  0x20   : > { %p2225_p8 = pnand %p2224_p7, %p2220_p3 }
  0x22   : > { %2228 = shalt.err (!%p2225_p8)
}
  0x23   : > { %s2229_s27 = scalar_lea.vmem %s2510_s21, 2048  ;;  %s2366_s20 = smov [#allocation2]  }
  0x24   : > { %p2230_p10 = scmp.ne.s32.totalorder %s2510_s21, %s2229_s27  ;;  %s2234_s19 = sshll.u32 %s2366_s20, 4  ;;  %s2235_s19 = int_to_ptr.vmem [resolvable:$false] %s2234_s19 }
  0x25   : > { %s2236_s28 = scalar_lea.vmem %s2235_s19, 4096  ;;  %p2237_p2 = scmp.lt.s32.totalorder %s2510_s21, %s2235_s19 }
  0x26   : > { %p2232_p9 = pnand %p2230_p10, %p2218_p1  ;;  %p2238_p12 = scmp.lt.s32.totalorder %s2236_s28, %s2229_s27 }
  0x28   : > { %p2233_p0 = pneg %p2232_p9  ;;  %p2239_p11 = por %p2238_p12, %p2237_p2 }
  0x2a   : > { %p2240_p6 = pnand %p2239_p11, %p2233_p0 }
  0x2c   : > { %2243 = shalt.err (!%p2240_p6)
}
  0x2d   : > { %s2367_s15 = smov 256   ;;  %s2368_s30 = smov 16  }
  0x2e   : > { %2142 = dma.hbm_to_vmem [thread:$0]  (!%p2506_p13), %s2502_s12, 2048, %s2510_s21, %s2512_s22, %s2367_s15, %s2367_s15, %s2368_s30  }
  0x2f   : > { %p2087_p9 = scmp.ge.s32.totalorder %s2364_s16, 1  ;;  %p339_p1 = scmp.lt.s32.totalorder %s2364_s16, 3 }
  0x31   : > { %p340_p3 = pnand %p2087_p9, %p339_p1 }
  0x32   : > { %s2536_s19 = sand.u32 (!%p340_p3), 1, %s2356_s14   ;;  %p3698_p6 = scmp.ne.s32.totalorder (!%p340_p3), %s3694_s24, 0 }
  0x33   : > { %343 = sbr.rel (%p340_p3) target bundleno = 805 (0x325), region = 52  ;;  %s2539_s29 = sshll.u32 (!%p340_p3), %s2536_s19, 7 }
  0x34   : > { %s346_s23 = scalar_lea.sflag (!%p340_p3), [#allocation3], %s2536_s19  ;;  %s2543_s11 = scalar_lea.vmem (!%p340_p3), [#allocation2], %s2539_s29 }
  0x38   : > { %2339 = dma.done.wait (%p3698_p6), %s346_s23, 2048  }
  0x39   : > { %2341 = vsyncadd (%p3698_p6), %s346_s23, 4294965248  ;;  %v2369_v0 = vmov 0   ;;  %v427_v1 = vld [vmem:[%s3672_s2 + $0x30] sm:$0xff]  ;;  %v428_v3 = vld [vmem:[%s3672_s2 + $0x38] sm:$0xff]  ;;  %s2740_s30 = scalar_lea.vmem [#allocation5], %s2539_s29  ;;  %s2370_s23 = smov 16  }
  0x3a   : > { %2200 = vset.pattern.permute.xlu1 %v2369_v0  ;;  %2199 = vset.pattern.permute.xlu0 %v2369_v0  ;;  %v419_v2 = vld [vmem:[%s3671_s1 + $0x30] sm:$0xff]  ;;  %v420_v4 = vld [vmem:[%s3671_s1 + $0x38] sm:$0xff]  ;;  %v418_v5 = vld [vmem:[%s3671_s1 + $0x28] sm:$0xff]  ;;  %s2371_s18 = smov 127   ;;  %s2372_s22 = smov 17   ;;  %vm823_vm0 = vcmask 130048  }
  0x3b   : > { %626 = vperm.xlu1 %2200, %v427_v1   ;;  %570 = vperm.xlu0 %2199, %v419_v2   ;;  %v417_v6 = vld [vmem:[%s3671_s1 + $0x20] sm:$0xff]  ;;  %v2573_v8 = vld [vmem:[%s2543_s11 + $0x8] sm:$0xff]  ;;  %v2576_v9 = vld [vmem:[%s2543_s11 + $0x10] sm:$0xff]  ;;  %s2374_s12 = smov 112   ;;  %vm1106_vm1 = vcmask 1039360   ;;  %s2375_s28 = smov 15  }
  0x3c   : > { %v2570_v7 = vld [vmem:[%s2543_s11] sm:$0xff]  ;;  %v2579_v10 = vld [vmem:[%s2543_s11 + $0x18] sm:$0xff]  ;;  %v2585_v12 = vld [vmem:[%s2543_s11 + $0x28] sm:$0xff]  ;;  %s2376_s15 = smov 113   ;;  %vm726_vm2 = vcmask 138240   ;;  %vm1017_vm3 = vcmask 7168  }
  0x3d   : > { %v2582_v11 = vld [vmem:[%s2543_s11 + $0x20] sm:$0xff]  ;;  %v429_v13 = vadd.f32 %v2576_v9, %v2570_v7  ;;  %v442_v14 = vadd.f32 %v2579_v10, %v2573_v8  ;;  %v426_v15 = vld [vmem:[%s3672_s2 + $0x28] sm:$0xff]  ;;  %v2595_v16 = vld [vmem:[%s2543_s11 + $0x30] sm:$0xff]  ;;  %vm1300_vm4 = vcmask 916480   ;;  %s2377_s21 = smov 111   ;;  %vm920_vm5 = vcmask 121856  }
  0x3e   : > { %v2598_v17 = vld [vmem:[%s2543_s11 + $0x38] sm:$0xff]  ;;  %v425_v18 = vld [vmem:[%s3672_s2 + $0x20] sm:$0xff]  ;;  %v2607_v20 = vld [vmem:[%s2543_s11 + $0x48] sm:$0xff]  ;;  %vm1203_vm6 = vcmask 924672   ;;  %vm1397_vm7 = vcmask 908288   ;;  %vm1577_vm8 = vcmask 523264  }
  0x3f   : > { %631 = vperm.xlu1 %2200, %v428_v3   ;;  %575 = vperm.xlu0 %2199, %v420_v4   ;;  %v2604_v19 = vld [vmem:[%s2543_s11 + $0x40] sm:$0xff]  ;;  %v430_v21 = vadd.f32 %v429_v13, %v2582_v11  ;;  %v443_v22 = vadd.f32 %v442_v14, %v2585_v12  ;;  %v2612_v23 = vld [vmem:[%s2543_s11 + $0x50] sm:$0xff]  ;;  %v2615_v24 = vld [vmem:[%s2543_s11 + $0x58] sm:$0xff]  ;;  %p3699_p12 = scmp.ne.s32.totalorder %s3695_s25, 0 }
  0x40   : > { %v416_v27 = vld [vmem:[%s3671_s1 + $0x18] sm:$0xff]  ;;  %v415_v28 = vld [vmem:[%s3671_s1 + $0x10] sm:$0xff]  ;;  %v2626_v29 = vld [vmem:[%s2543_s11 + $0x60] sm:$0xff] }
  0x41   : > { %v431_v25 = vadd.f32 %v430_v21, %v2595_v16  ;;  %v444_v26 = vadd.f32 %v443_v22, %v2598_v17  ;;  %v2629_v30 = vld [vmem:[%s2543_s11 + $0x68] sm:$0xff]  ;;  %v2636_v35 = vld [vmem:[%s2543_s11 + $0x70] sm:$0xff]  ;;  %v2639_v36 = vld [vmem:[%s2543_s11 + $0x78] sm:$0xff]  ;;  %s2373_s11 = smov 1  }
  0x42   : > { %v424_v39 = vld [vmem:[%s3672_s2 + $0x18] sm:$0xff]  ;;  %v423_v40 = vld [vmem:[%s3672_s2 + $0x10] sm:$0xff]  ;;  %v414_v45 = vld [vmem:[%s3671_s1 + $0x8] sm:$0xff] }
  0x43   : > { %565 = vperm.xlu1 %2200, %v418_v5   ;;  %560 = vperm.xlu0 %2199, %v417_v6   ;;  %v432_v31 = vadd.f32 %v431_v25, %v2604_v19  ;;  %v445_v32 = vadd.f32 %v444_v26, %v2607_v20  ;;  %v413_v46 = vld [vmem:[%s3671_s1] sm:$0xff]  ;;  %v422_v51 = vld [vmem:[%s3672_s2 + $0x8] sm:$0xff] }
  0x44   : > { %v421_v52 = vld [vmem:[%s3672_s2] sm:$0xff] }
  0x45   : > { %v433_v33 = vadd.f32 %v432_v31, %v2612_v23  ;;  %v446_v34 = vadd.f32 %v445_v32, %v2615_v24 }
  0x47   : > { %621 = vperm.xlu1 %2200, %v426_v15   ;;  %616 = vperm.xlu0 %2199, %v425_v18   ;;  %v434_v37 = vadd.f32 %v433_v33, %v2626_v29  ;;  %v447_v38 = vadd.f32 %v446_v34, %v2629_v30 }
  0x49   : > { %v435_v41 = vadd.f32 %v434_v37, %v2636_v35  ;;  %v448_v42 = vadd.f32 %v447_v38, %v2639_v36 }
  0x4b   : > { %555 = vperm.xlu1 %2200, %v416_v27   ;;  %550 = vperm.xlu0 %2199, %v415_v28   ;;  %v436_v43 = vrot.slane %v435_v41, 4  ;;  %v449_v44 = vrot.slane %v448_v42, 4 }
  0x4d   : > { %v437_v47 = vadd.f32 %v436_v43, %v435_v41  ;;  %v450_v48 = vadd.f32 %v449_v44, %v448_v42 }
  0x4f   : > { %611 = vperm.xlu1 %2200, %v424_v39   ;;  %606 = vperm.xlu0 %2199, %v423_v40   ;;  %v438_v49 = vrot.slane %v437_v47, 2  ;;  %v451_v50 = vrot.slane %v450_v48, 2 }
  0x51   : > { %v439_v53 = vadd.f32 %v438_v49, %v437_v47  ;;  %v452_v54 = vadd.f32 %v451_v50, %v450_v48 }
  0x53   : > { %545 = vperm.xlu1 %2200, %v414_v45   ;;  %540 = vperm.xlu0 %2199, %v413_v46   ;;  %v440_v55 = vrot.slane %v439_v53, 1  ;;  %v453_v56 = vrot.slane %v452_v54, 1 }
  0x55   : > { %v441_v57 = vadd.f32 %v440_v55, %v439_v53  ;;  %v454_v58 = vadd.f32 %v453_v56, %v452_v54 }
  0x57   : > { %601 = vperm.xlu1 %2200, %v422_v51   ;;  %596 = vperm.xlu0 %2199, %v421_v52   ;;  %v456_v59 = vmul.f32 0.015625, %v441_v57  ;;  %v457_v60 = vmul.f32 0.015625, %v454_v58 }
  0x59   : > { %v2664_v61 = vsub.f32 %v2570_v7, %v456_v59  ;;  %v2667_v62 = vsub.f32 %v2576_v9, %v456_v59  ;;  %v2670_v63 = vsub.f32 %v2573_v8, %v457_v60  ;;  %v2673_v1 = vsub.f32 %v2579_v10, %v457_v60 }
  0x5a   : > { %v2676_v2 = vsub.f32 %v2582_v11, %v456_v59  ;;  %v2683_v5 = vsub.f32 %v2585_v12, %v457_v60  ;;  %v2690_v8 = vsub.f32 %v2595_v16, %v456_v59  ;;  %v2695_v11 = vsub.f32 %v2598_v17, %v457_v60 }
  0x5b   : > { %v474_v3 = vmul.f32 %v2664_v61, %v2664_v61  ;;  %v476_v4 = vmul.f32 %v2667_v62, %v2667_v62  ;;  %v475_v6 = vmul.f32 %v2670_v63, %v2670_v63  ;;  %v477_v7 = vmul.f32 %v2673_v1, %v2673_v1 }
  0x5c   : > { %v478_v9 = vmul.f32 %v2676_v2, %v2676_v2  ;;  %v479_v12 = vmul.f32 %v2683_v5, %v2683_v5  ;;  %v2700_v14 = vsub.f32 %v2604_v19, %v456_v59  ;;  %v480_v15 = vmul.f32 %v2690_v8, %v2690_v8 }
  0x5d   : > { %v490_v10 = vadd.f32 %v476_v4, %v474_v3  ;;  %v503_v13 = vadd.f32 %v477_v7, %v475_v6  ;;  %v2705_v16 = vsub.f32 %v2607_v20, %v457_v60  ;;  %v481_v21 = vmul.f32 %v2695_v11, %v2695_v11 }
  0x5e   : > { %v2710_v17 = vsub.f32 %v2612_v23, %v456_v59  ;;  %v482_v25 = vmul.f32 %v2700_v14, %v2700_v14  ;;  %v2715_v19 = vsub.f32 %v2615_v24, %v457_v60  ;;  %v470_v20 = vsub.f32 %v2626_v29, %v456_v59 }
  0x5f   : > { %v491_v18 = vadd.f32 %v490_v10, %v478_v9  ;;  %v504_v22 = vadd.f32 %v503_v13, %v479_v12  ;;  %v483_v27 = vmul.f32 %v2705_v16, %v2705_v16  ;;  %v471_v23 = vsub.f32 %v2629_v30, %v457_v60 }
  0x60   : > { %v484_v31 = vmul.f32 %v2710_v17, %v2710_v17  ;;  %v485_v33 = vmul.f32 %v2715_v19, %v2715_v19  ;;  %v472_v37 = vsub.f32 %v2636_v35, %v456_v59  ;;  %v486_v24 = vmul.f32 %v470_v20, %v470_v20 }
  0x61   : > { %v492_v26 = vadd.f32 %v491_v18, %v480_v15  ;;  %v505_v28 = vadd.f32 %v504_v22, %v481_v21  ;;  %v473_v39 = vsub.f32 %v2639_v36, %v457_v60  ;;  %v487_v40 = vmul.f32 %v471_v23, %v471_v23 }
  0x62   : > { %v488_v42 = vmul.f32 %v472_v37, %v472_v37 }
  0x63   : > { %v493_v32 = vadd.f32 %v492_v26, %v482_v25  ;;  %v506_v34 = vadd.f32 %v505_v28, %v483_v27  ;;  %v489_v43 = vmul.f32 %v473_v39, %v473_v39 }
  0x65   : > { %v494_v38 = vadd.f32 %v493_v32, %v484_v31  ;;  %v507_v41 = vadd.f32 %v506_v34, %v485_v33 }
  0x67   : > { %v495_v29 = vadd.f32 %v494_v38, %v486_v24  ;;  %v508_v44 = vadd.f32 %v507_v41, %v487_v40 }
  0x69   : > { %v496_v45 = vadd.f32 %v495_v29, %v488_v42  ;;  %v509_v46 = vadd.f32 %v508_v44, %v489_v43 }
  0x6b   : > { %v497_v47 = vrot.slane %v496_v45, 4  ;;  %v510_v30 = vrot.slane %v509_v46, 4 }
  0x6d   : > { %v498_v48 = vadd.f32 %v497_v47, %v496_v45  ;;  %v511_v49 = vadd.f32 %v510_v30, %v509_v46 }
  0x6f   : > { %v499_v50 = vrot.slane %v498_v48, 2  ;;  %v512_v51 = vrot.slane %v511_v49, 2 }
  0x71   : > { %v500_v52 = vadd.f32 %v499_v50, %v498_v48  ;;  %v513_v35 = vadd.f32 %v512_v51, %v511_v49 }
  0x73   : > { %v501_v53 = vrot.slane %v500_v52, 1  ;;  %v514_v54 = vrot.slane %v513_v35, 1 }
  0x75   : > { %v502_v55 = vadd.f32 %v501_v53, %v500_v52  ;;  %v515_v36 = vadd.f32 %v514_v54, %v513_v35 }
  0x77   : > { %v516_v56 = vmul.f32 0.015625, %v502_v55  ;;  %v517_v57 = vmul.f32 0.015625, %v515_v36 }
  0x79   : > { %v518_v58 = vadd.f32 1e-06, %v516_v56  ;;  %v519_v59 = vadd.f32 1e-06, %v517_v57 }
  0x7b   : > { %2212 = vrsqrt.f32 %v518_v58 }
  0x7c   : > { %2214 = vrsqrt.f32 %v519_v59 }
  0x88   : > { %v2727_v60 = vpop.eup %2212 }
  0x89   : > { %v2729_v3 = vpop.eup %2214  ;;  %v534_v4 = vmul.f32 %v2727_v60, %v470_v20  ;;  %v536_v13 = vmul.f32 %v2727_v60, %v472_v37  ;;  %v532_v28 = vmul.f32 %v2727_v60, %v2710_v17  ;;  %v530_v20 = vmul.f32 %v2727_v60, %v2700_v14 }
  0x8a   : > { %v535_v6 = vmul.f32 %v2729_v3, %v471_v23  ;;  %v537_v15 = vmul.f32 %v2729_v3, %v473_v39  ;;  %v533_v23 = vmul.f32 %v2729_v3, %v2715_v19  ;;  %v531_v33 = vmul.f32 %v2729_v3, %v2705_v16 }
  0x8b   : > { %v528_v29 = vmul.f32 %v2727_v60, %v2690_v8  ;;  %v529_v43 = vmul.f32 %v2729_v3, %v2695_v11  ;;  %v526_v44 = vmul.f32 %v2727_v60, %v2676_v2  ;;  %v527_v45 = vmul.f32 %v2729_v3, %v2683_v5 }
  0x8c   : > { %v524_v35 = vmul.f32 %v2727_v60, %v2667_v62  ;;  %v525_v53 = vmul.f32 %v2729_v3, %v2673_v1  ;;  %v522_v54 = vmul.f32 %v2727_v60, %v2664_v61  ;;  %v523_v55 = vmul.f32 %v2729_v3, %v2670_v63 }
  0xb6   : > { %v627_v7 = vpop.permute.xlu1 %626  ;;  %v571_v9 = vpop.permute.xlu0 %570 }
  0xb7   : > { %v590_v10 = vmul.f32 %v571_v9, %v534_v4  ;;  %v591_v12 = vmul.f32 %v571_v9, %v535_v6  ;;  %v759_v6 = vlaneseq }
  0xb9   : > { %v2735_v18 = vadd.f32 %v627_v7, %v590_v10  ;;  %v2737_v21 = vadd.f32 %v627_v7, %v591_v12  ;;  %v2922_v7 = vshrl.u32 %v759_v6, 7  ;;  %v2934_v12 = vld [vmem:[%s3677_s7 + $0x8] sm:$0xff] }
  0xba   : > { %v632_v22 = vpop.permute.xlu1 %631  ;;  %v576_v25 = vpop.permute.xlu0 %575 }
  0xbb   : > { %662 = vst [vmem:[%s2740_s30 + $0x60] sm:$0xff] %v2735_v18  ;;  %663 = vst [vmem:[%s2740_s30 + $0x68] sm:$0xff] %v2737_v21  ;;  %v592_v26 = vmul.f32 %v576_v25, %v536_v13  ;;  %v593_v27 = vmul.f32 %v576_v25, %v537_v15  ;;  %795 = vrot.lane.b32.xlu0 %v2737_v21, %s2370_s23  ;;  %v858_v10 = vsub.s32 1, %v2922_v7  ;;  %v2939_v13 = vld [vmem:[%s3677_s7] sm:$0xff] }
  0xbd   : > { %v2752_v31 = vadd.f32 %v632_v22, %v592_v26  ;;  %v2754_v32 = vadd.f32 %v632_v22, %v593_v27  ;;  %v2944_v25 = vrot.slane %v2934_v12, %v858_v10  ;;  %v2947_v26 = vrot.slane %v2939_v13, %v858_v10 }
  0xbe   : > { %v566_v34 = vpop.permute.xlu1 %565  ;;  %v561_v37 = vpop.permute.xlu0 %560 }
  0xbf   : > { %664 = vst [vmem:[%s2740_s30 + $0x70] sm:$0xff] %v2752_v31  ;;  %665 = vst [vmem:[%s2740_s30 + $0x78] sm:$0xff] %v2754_v32  ;;  %797 = vrot.lane.b32.xlu1 %v2754_v32, %s2370_s23  ;;  %819 = vrot.lane.b32.xlu0 %v2735_v18, %s2370_s23  ;;  %v588_v14 = vmul.f32 %v566_v34, %v532_v28  ;;  %v589_v17 = vmul.f32 %v566_v34, %v533_v23 }
  0xc0   : > { %v586_v19 = vmul.f32 %v561_v37, %v530_v20  ;;  %v587_v16 = vmul.f32 %v561_v37, %v531_v33  ;;  %v1149_v37 = vsub.s32 5, %v2922_v7 }
  0xc2   : > { %v622_v24 = vpop.permute.xlu1 %621  ;;  %v617_v38 = vpop.permute.xlu0 %616 }
  0xc3   : > { %v2768_v39 = vadd.f32 %v622_v24, %v588_v14  ;;  %v2770_v40 = vadd.f32 %v622_v24, %v589_v17  ;;  %v2772_v41 = vadd.f32 %v617_v38, %v586_v19  ;;  %v2774_v42 = vadd.f32 %v617_v38, %v587_v16  ;;  %821 = vrot.lane.b32.xlu1 %v2752_v31, %s2370_s23 }
  0xc4   : > { %1098 = vrot.lane.b32.xlu0 %v2735_v18, %s2371_s18 }
  0xc5   : > { %660 = vst [vmem:[%s2740_s30 + $0x50] sm:$0xff] %v2768_v39  ;;  %661 = vst [vmem:[%s2740_s30 + $0x58] sm:$0xff] %v2770_v40 }
  0xc6   : > { %658 = vst [vmem:[%s2740_s30 + $0x40] sm:$0xff] %v2772_v41  ;;  %659 = vst [vmem:[%s2740_s30 + $0x48] sm:$0xff] %v2774_v42  ;;  %v556_v46 = vpop.permute.xlu1 %555  ;;  %v551_v47 = vpop.permute.xlu0 %550 }
  0xc7   : > { %1100 = vrot.lane.b32.xlu1 %v2737_v21, %s2371_s18  ;;  %v584_v8 = vmul.f32 %v556_v46, %v528_v29  ;;  %v585_v11 = vmul.f32 %v556_v46, %v529_v43  ;;  %v582_v30 = vmul.f32 %v551_v47, %v526_v44  ;;  %v583_v48 = vmul.f32 %v551_v47, %v527_v45 }
  0xc8   : > { %1102 = vrot.lane.b32.xlu0 %v2752_v31, %s2371_s18  ;;  %v2967_v44 = vrot.slane %v2934_v12, %v1149_v37  ;;  %v2970_v45 = vrot.slane %v2939_v13, %v1149_v37 }
  0xca   : > { %v612_v2 = vpop.permute.xlu1 %611  ;;  %v607_v49 = vpop.permute.xlu0 %606 }
  0xcb   : > { %v2800_v50 = vadd.f32 %v612_v2, %v584_v8  ;;  %v2802_v5 = vadd.f32 %v612_v2, %v585_v11  ;;  %v2804_v51 = vadd.f32 %v607_v49, %v582_v30  ;;  %v2806_v52 = vadd.f32 %v607_v49, %v583_v48  ;;  %1104 = vrot.lane.b32.xlu1 %v2754_v32, %s2371_s18 }
  0xcc   : > { %791 = vrot.lane.b32.xlu0 %v2774_v42, %s2370_s23 }
  0xcd   : > { %656 = vst [vmem:[%s2740_s30 + $0x30] sm:$0xff] %v2800_v50  ;;  %657 = vst [vmem:[%s2740_s30 + $0x38] sm:$0xff] %v2802_v5 }
  0xce   : > { %654 = vst [vmem:[%s2740_s30 + $0x20] sm:$0xff] %v2804_v51  ;;  %655 = vst [vmem:[%s2740_s30 + $0x28] sm:$0xff] %v2806_v52  ;;  %v546_v36 = vpop.permute.xlu1 %545  ;;  %v541_v56 = vpop.permute.xlu0 %540 }
  0xcf   : > { %793 = vrot.lane.b32.xlu1 %v2770_v40, %s2370_s23  ;;  %v580_v62 = vmul.f32 %v546_v36, %v524_v35  ;;  %v581_v1 = vmul.f32 %v546_v36, %v525_v53  ;;  %v578_v57 = vmul.f32 %v541_v56, %v522_v54  ;;  %v579_v58 = vmul.f32 %v541_v56, %v523_v55 }
  0xd0   : > { %815 = vrot.lane.b32.xlu0 %v2772_v41, %s2370_s23 }
  0xd2   : > { %v602_v61 = vpop.permute.xlu1 %601  ;;  %v597_v59 = vpop.permute.xlu0 %596 }
  0xd3   : > { %v2832_v60 = vadd.f32 %v602_v61, %v580_v62  ;;  %v2834_v63 = vadd.f32 %v602_v61, %v581_v1  ;;  %v2836_v3 = vadd.f32 %v597_v59, %v578_v57  ;;  %v2838_v4 = vadd.f32 %v597_v59, %v579_v58  ;;  %817 = vrot.lane.b32.xlu1 %v2768_v39, %s2370_s23 }
  0xd4   : > { %1090 = vrot.lane.b32.xlu0 %v2772_v41, %s2371_s18 }
  0xd5   : > { %652 = vst [vmem:[%s2740_s30 + $0x10] sm:$0xff] %v2832_v60  ;;  %653 = vst [vmem:[%s2740_s30 + $0x18] sm:$0xff] %v2834_v63 }
  0xd6   : > { %650 = vst [vmem:[%s2740_s30] sm:$0xff] %v2836_v3  ;;  %651 = vst [vmem:[%s2740_s30 + $0x8] sm:$0xff] %v2838_v4 }
  0xd7   : > { %1092 = vrot.lane.b32.xlu1 %v2774_v42, %s2371_s18 }
  0xd8   : > { %1094 = vrot.lane.b32.xlu0 %v2768_v39, %s2371_s18 }
  0xdb   : > { %1096 = vrot.lane.b32.xlu1 %v2770_v40, %s2371_s18 }
  0xdc   : > { %787 = vrot.lane.b32.xlu0 %v2806_v52, %s2370_s23 }
  0xdf   : > { %789 = vrot.lane.b32.xlu1 %v2802_v5, %s2370_s23 }
  0xe0   : > { %811 = vrot.lane.b32.xlu0 %v2804_v51, %s2370_s23 }
  0xe3   : > { %813 = vrot.lane.b32.xlu1 %v2800_v50, %s2370_s23 }
  0xe4   : > { %1082 = vrot.lane.b32.xlu0 %v2804_v51, %s2371_s18 }
  0xe7   : > { %1084 = vrot.lane.b32.xlu1 %v2806_v52, %s2371_s18 }
  0xe8   : > { %1086 = vrot.lane.b32.xlu0 %v2800_v50, %s2371_s18 }
  0xeb   : > { %1088 = vrot.lane.b32.xlu1 %v2802_v5, %s2371_s18 }
  0xec   : > { %783 = vrot.lane.b32.xlu0 %v2838_v4, %s2370_s23 }
  0xef   : > { %785 = vrot.lane.b32.xlu1 %v2834_v63, %s2370_s23 }
  0xf0   : > { %807 = vrot.lane.b32.xlu0 %v2836_v3, %s2370_s23 }
  0xf3   : > { %809 = vrot.lane.b32.xlu1 %v2832_v60, %s2370_s23 }
  0xf4   : > { %1074 = vrot.lane.b32.xlu0 %v2836_v3, %s2371_s18 }
  0xf7   : > { %1076 = vrot.lane.b32.xlu1 %v2838_v4, %s2371_s18 }
  0xf8   : > { %1078 = vrot.lane.b32.xlu0 %v2832_v60, %s2371_s18 }
  0xfb   : > { %1080 = vrot.lane.b32.xlu1 %v2834_v63, %s2371_s18  ;;  %s2378_s18 = smov [#allocation5]  }
  0xfc   : > { %690 = vrot.lane.b32.xlu0 %v2737_v21, %s2372_s22 }
  0xff   : > { %692 = vrot.lane.b32.xlu1 %v2754_v32, %s2372_s22 }
 0x100   : > { %722 = vrot.lane.b32.xlu0 %v2735_v18, %s2372_s22 }
 0x103   : > { %724 = vrot.lane.b32.xlu1 %v2752_v31, %s2372_s22 }
 0x104   : > { %686 = vrot.lane.b32.xlu0 %v2774_v42, %s2372_s22 }
 0x107   : > { %688 = vrot.lane.b32.xlu1 %v2770_v40, %s2372_s22 }
 0x108   : > { %718 = vrot.lane.b32.xlu0 %v2772_v41, %s2372_s22 }
 0x10b   : > { %720 = vrot.lane.b32.xlu1 %v2768_v39, %s2372_s22 }
 0x10c   : > { %682 = vrot.lane.b32.xlu0 %v2806_v52, %s2372_s22 }
 0x10f   : > { %684 = vrot.lane.b32.xlu1 %v2802_v5, %s2372_s22 }
 0x110   : > { %714 = vrot.lane.b32.xlu0 %v2804_v51, %s2372_s22 }
 0x113   : > { %716 = vrot.lane.b32.xlu1 %v2800_v50, %s2372_s22 }
 0x114   : > { %678 = vrot.lane.b32.xlu0 %v2838_v4, %s2372_s22 }
 0x117   : > { %680 = vrot.lane.b32.xlu1 %v2834_v63, %s2372_s22 }
 0x118   : > { %710 = vrot.lane.b32.xlu0 %v2836_v3, %s2372_s22 }
 0x11b   : > { %712 = vrot.lane.b32.xlu1 %v2832_v60, %s2372_s22  ;;  %s2248_s22 = sshll.u32 %s2378_s18, 4  ;;  %s2249_s22 = int_to_ptr.vmem [resolvable:$false] %s2248_s22 }
 0x11c   : > { %989 = vrot.lane.b32.xlu0 %v2737_v21, %s2373_s11 }
 0x11f   : > { %991 = vrot.lane.b32.xlu1 %v2754_v32, %s2373_s11 }
 0x120   : > { %1013 = vrot.lane.b32.xlu0 %v2735_v18, %s2373_s11 }
 0x123   : > { %1015 = vrot.lane.b32.xlu1 %v2752_v31, %s2373_s11 }
 0x124   : > { %1292 = vrot.lane.b32.xlu0 %v2735_v18, %s2374_s12 }
 0x127   : > { %1294 = vrot.lane.b32.xlu1 %v2737_v21, %s2374_s12 }
 0x128   : > { %1296 = vrot.lane.b32.xlu0 %v2752_v31, %s2374_s12 }
 0x12b   : > { %1298 = vrot.lane.b32.xlu1 %v2754_v32, %s2374_s12 }
 0x12c   : > { %985 = vrot.lane.b32.xlu0 %v2774_v42, %s2373_s11 }
 0x12d   : > { %v796_v9 = vpop.permute.xlu0 %795 }
 0x12f   : > { %987 = vrot.lane.b32.xlu1 %v2770_v40, %s2373_s11 }
 0x130   : > { %1009 = vrot.lane.b32.xlu0 %v2772_v41, %s2373_s11 }
 0x131   : > { %v798_v15 = vpop.permute.xlu1 %797  ;;  %v820_v22 = vpop.permute.xlu0 %819 }
 0x132   : > { %v854_v27 = vsel %vm823_vm0, %v796_v9, %v820_v22  ;;  %v830_v28 = vsel %vm823_vm0, %v820_v22, %v796_v9 }
 0x133   : > { %1011 = vrot.lane.b32.xlu1 %v2768_v39, %s2373_s11  ;;  %v877_v14 = vmul.f32 %v2944_v25, %v830_v28  ;;  %v876_v19 = vmul.f32 %v2947_v26, %v854_v27 }
 0x134   : > { %1284 = vrot.lane.b32.xlu0 %v2772_v41, %s2374_s12 }
 0x135   : > { %v822_v20 = vpop.permute.xlu1 %821 }
 0x136   : > { %v855_v23 = vsel %vm823_vm0, %v798_v15, %v822_v20  ;;  %v1099_v33 = vpop.permute.xlu0 %1098  ;;  %v831_v34 = vsel %vm823_vm0, %v822_v20, %v798_v15 }
 0x137   : > { %1286 = vrot.lane.b32.xlu1 %v2774_v42, %s2374_s12  ;;  %v879_v17 = vmul.f32 %v2944_v25, %v831_v34  ;;  %v878_v16 = vmul.f32 %v2947_v26, %v855_v23 }
 0x138   : > { %1288 = vrot.lane.b32.xlu0 %v2768_v39, %s2374_s12 }
 0x139   : > { %v1101_v24 = vpop.permute.xlu1 %1100  ;;  %v1477_v38 = vpack.c.bf16 %v879_v17, %v877_v14  ;;  %v1476_v29 = vpack.c.bf16 %v878_v16, %v876_v19 }
 0x13a   : > { %v1103_v43 = vpop.permute.xlu0 %1102  ;;  %v1113_v46 = vsel %vm1106_vm1, %v1099_v33, %v1101_v24  ;;  %v1145_v47 = vsel %vm1106_vm1, %v1101_v24, %v1099_v33 }
 0x13b   : > { %1581 = vmatprep.subr.bf16.mxu0 %v1477_v38  ;;  %1290 = vrot.lane.b32.xlu1 %v2770_v40, %s2374_s12  ;;  %v1168_v2 = vmul.f32 %v2967_v44, %v1145_v47  ;;  %v1167_v35 = vmul.f32 %v2970_v45, %v1113_v46 }
 0x13c   : > { %981 = vrot.lane.b32.xlu0 %v2806_v52, %s2373_s11  ;;  %1582 = vmatpush1.bf16.msra.mxu0 %v1476_v29 }
 0x13d   : > { %v1105_v8 = vpop.permute.xlu1 %1104 }
 0x13e   : > { %v1114_v11 = vsel %vm1106_vm1, %v1103_v43, %v1105_v8  ;;  %v792_v30 = vpop.permute.xlu0 %791  ;;  %v1146_v48 = vsel %vm1106_vm1, %v1105_v8, %v1103_v43 }
 0x13f   : > { %983 = vrot.lane.b32.xlu1 %v2802_v5, %s2373_s11  ;;  %v1170_v49 = vmul.f32 %v2967_v44, %v1146_v48  ;;  %v1169_v53 = vmul.f32 %v2970_v45, %v1114_v11 }
 0x140   : > { %1005 = vrot.lane.b32.xlu0 %v2804_v51, %s2373_s11 }
 0x141   : > { %v794_v54 = vpop.permute.xlu1 %793  ;;  %v1509_v55 = vpack.c.bf16 %v1170_v49, %v1168_v2  ;;  %v1508_v36 = vpack.c.bf16 %v1169_v53, %v1167_v35 }
 0x142   : > { %v816_v56 = vpop.permute.xlu0 %815 }
 0x143   : > { %1624 = vmatprep.subr.bf16.mxu1 %v1509_v55  ;;  %1007 = vrot.lane.b32.xlu1 %v2800_v50, %s2373_s11  ;;  %v828_v62 = vsel %vm823_vm0, %v816_v56, %v792_v30  ;;  %v852_v1 = vsel %vm823_vm0, %v792_v30, %v816_v56 }
 0x144   : > { %1276 = vrot.lane.b32.xlu0 %v2804_v51, %s2374_s12  ;;  %1625 = vmatpush1.bf16.msra.mxu1 %v1508_v36  ;;  %v872_v6 = vmul.f32 %v2947_v26, %v852_v1  ;;  %v873_v9 = vmul.f32 %v2944_v25, %v828_v62 }
 0x145   : > { %v818_v57 = vpop.permute.xlu1 %817 }
 0x146   : > { %v829_v58 = vsel %vm823_vm0, %v818_v57, %v794_v54  ;;  %v853_v61 = vsel %vm823_vm0, %v794_v54, %v818_v57  ;;  %v1091_v59 = vpop.permute.xlu0 %1090 }
 0x147   : > { %v874_v10 = vmul.f32 %v2947_v26, %v853_v61  ;;  %v875_v15 = vmul.f32 %v2944_v25, %v829_v58  ;;  %1278 = vrot.lane.b32.xlu1 %v2806_v52, %s2374_s12 }
 0x148   : > { %1280 = vrot.lane.b32.xlu0 %v2800_v50, %s2374_s12 }
 0x149   : > { %v1093_v22 = vpop.permute.xlu1 %1092  ;;  %v1475_v27 = vpack.c.bf16 %v875_v15, %v873_v9  ;;  %v1474_v28 = vpack.c.bf16 %v874_v10, %v872_v6 }
 0x14a   : > { %v1095_v20 = vpop.permute.xlu0 %1094  ;;  %v1111_v23 = vsel %vm1106_vm1, %v1091_v59, %v1093_v22  ;;  %v1143_v33 = vsel %vm1106_vm1, %v1093_v22, %v1091_v59 }
 0x14b   : > { %1583 = vmatprep.subr.bf16.mxu0 %v1475_v27  ;;  %1282 = vrot.lane.b32.xlu1 %v2802_v5, %s2374_s12  ;;  %v1163_v19 = vmul.f32 %v2970_v45, %v1111_v23  ;;  %v1164_v16 = vmul.f32 %v2967_v44, %v1143_v33 }
 0x14c   : > { %977 = vrot.lane.b32.xlu0 %v2838_v4, %s2373_s11  ;;  %1584 = vmatpush1.bf16.msra.mxu0 %v1474_v28 }
 0x14d   : > { %v1097_v34 = vpop.permute.xlu1 %1096 }
 0x14e   : > { %v1112_v37 = vsel %vm1106_vm1, %v1095_v20, %v1097_v34  ;;  %v1144_v14 = vsel %vm1106_vm1, %v1097_v34, %v1095_v20  ;;  %v788_v17 = vpop.permute.xlu0 %787 }
 0x14f   : > { %v1165_v24 = vmul.f32 %v2970_v45, %v1112_v37  ;;  %v1166_v38 = vmul.f32 %v2967_v44, %v1144_v14  ;;  %979 = vrot.lane.b32.xlu1 %v2834_v63, %s2373_s11 }
 0x150   : > { %1001 = vrot.lane.b32.xlu0 %v2836_v3, %s2373_s11 }
 0x151   : > { %v790_v29 = vpop.permute.xlu1 %789  ;;  %v1507_v43 = vpack.c.bf16 %v1166_v38, %v1164_v16  ;;  %v1506_v46 = vpack.c.bf16 %v1165_v24, %v1163_v19 }
 0x152   : > { %v812_v47 = vpop.permute.xlu0 %811 }
 0x153   : > { %1626 = vmatprep.subr.bf16.mxu1 %v1507_v43  ;;  %1003 = vrot.lane.b32.xlu1 %v2832_v60, %s2373_s11  ;;  %v826_v8 = vsel %vm823_vm0, %v812_v47, %v788_v17  ;;  %v850_v11 = vsel %vm823_vm0, %v788_v17, %v812_v47 }
 0x154   : > { %1268 = vrot.lane.b32.xlu0 %v2836_v3, %s2374_s12  ;;  %1627 = vmatpush1.bf16.msra.mxu1 %v1506_v46  ;;  %v868_v35 = vmul.f32 %v2947_v26, %v850_v11  ;;  %v869_v53 = vmul.f32 %v2944_v25, %v826_v8 }
 0x155   : > { %v814_v30 = vpop.permute.xlu1 %813 }
 0x156   : > { %v827_v48 = vsel %vm823_vm0, %v814_v30, %v790_v29  ;;  %v851_v2 = vsel %vm823_vm0, %v790_v29, %v814_v30  ;;  %v1083_v49 = vpop.permute.xlu0 %1082 }
 0x157   : > { %v870_v54 = vmul.f32 %v2947_v26, %v851_v2  ;;  %v871_v55 = vmul.f32 %v2944_v25, %v827_v48  ;;  %1270 = vrot.lane.b32.xlu1 %v2838_v4, %s2374_s12 }
 0x158   : > { %1272 = vrot.lane.b32.xlu0 %v2832_v60, %s2374_s12 }
 0x159   : > { %v1085_v36 = vpop.permute.xlu1 %1084  ;;  %v1473_v56 = vpack.c.bf16 %v871_v55, %v869_v53  ;;  %v1472_v62 = vpack.c.bf16 %v870_v54, %v868_v35  ;;  %v761_v35 = vsub.s32 0, %v2922_v7 }
 0x15a   : > { %v1087_v1 = vpop.permute.xlu0 %1086  ;;  %v1109_v57 = vsel %vm1106_vm1, %v1083_v49, %v1085_v36  ;;  %v1141_v58 = vsel %vm1106_vm1, %v1085_v36, %v1083_v49 }
 0x15b   : > { %1585 = vmatprep.subr.bf16.mxu0 %v1473_v56  ;;  %1274 = vrot.lane.b32.xlu1 %v2834_v63, %s2374_s12  ;;  %v1159_v10 = vmul.f32 %v2970_v45, %v1109_v57  ;;  %v1160_v15 = vmul.f32 %v2967_v44, %v1141_v58  ;;  %v3084_v58 = vrot.slane %v2939_v13, %v761_v35  ;;  %s3687_s12 = sshll.u32 %s2458_s17, 11 }
 0x15c   : > { %892 = vrot.lane.b32.xlu0 %v2737_v21, %s2375_s28  ;;  %1586 = vmatpush1.bf16.msra.mxu0 %v1472_v62  ;;  %s3523_s20 = scalar_lea.hbm %s3678_s8, %s3687_s12 }
 0x15d   : > { %v1089_v61 = vpop.permute.xlu1 %1088 }
 0x15e   : > { %v1110_v59 = vsel %vm1106_vm1, %v1087_v1, %v1089_v61  ;;  %v1142_v6 = vsel %vm1106_vm1, %v1089_v61, %v1087_v1  ;;  %v784_v9 = vpop.permute.xlu0 %783  ;;  %v3087_v61 = vrot.slane %v2934_v12, %v761_v35 }
 0x15f   : > { %v1161_v22 = vmul.f32 %v2970_v45, %v1110_v59  ;;  %v1162_v27 = vmul.f32 %v2967_v44, %v1142_v6  ;;  %894 = vrot.lane.b32.xlu1 %v2754_v32, %s2375_s28 }
 0x160   : > { %916 = vrot.lane.b32.xlu0 %v2735_v18, %s2375_s28 }
 0x161   : > { %v786_v28 = vpop.permute.xlu1 %785  ;;  %v1505_v20 = vpack.c.bf16 %v1162_v27, %v1160_v15  ;;  %v1504_v23 = vpack.c.bf16 %v1161_v22, %v1159_v10  ;;  %v3104_v22 = vpack.c.bf16 %v2752_v31, %v2735_v18  ;;  %v3108_v27 = vpack.c.bf16 %v2770_v40, %v2774_v42 }
 0x162   : > { %v808_v33 = vpop.permute.xlu0 %807 }
 0x163   : > { %1628 = vmatprep.subr.bf16.mxu1 %v1505_v20  ;;  %918 = vrot.lane.b32.xlu1 %v2752_v31, %s2375_s28  ;;  %v824_v34 = vsel %vm823_vm0, %v808_v33, %v784_v9  ;;  %v848_v37 = vsel %vm823_vm0, %v784_v9, %v808_v33 }
 0x164   : > { %1195 = vrot.lane.b32.xlu0 %v2735_v18, %s2376_s15  ;;  %1629 = vmatpush1.bf16.msra.mxu1 %v1504_v23  ;;  %v864_v24 = vmul.f32 %v2947_v26, %v848_v37  ;;  %v865_v38 = vmul.f32 %v2944_v25, %v824_v34 }
 0x165   : > { %v810_v14 = vpop.permute.xlu1 %809 }
 0x166   : > { %v825_v17 = vsel %vm823_vm0, %v810_v14, %v786_v28  ;;  %v849_v19 = vsel %vm823_vm0, %v786_v28, %v810_v14  ;;  %v1075_v16 = vpop.permute.xlu0 %1074 }
 0x167   : > { %v866_v29 = vmul.f32 %v2947_v26, %v849_v19  ;;  %v867_v43 = vmul.f32 %v2944_v25, %v825_v17  ;;  %1197 = vrot.lane.b32.xlu1 %v2737_v21, %s2376_s15  ;;  %v3124_v19 = vpack.c.bf16 %v2768_v39, %v2772_v41 }
 0x168   : > { %1199 = vrot.lane.b32.xlu0 %v2752_v31, %s2376_s15 }
 0x169   : > { %v1077_v46 = vpop.permute.xlu1 %1076  ;;  %v1471_v47 = vpack.c.bf16 %v867_v43, %v865_v38  ;;  %v1470_v8 = vpack.c.bf16 %v866_v29, %v864_v24  ;;  %v3132_v38 = vpack.c.bf16 %v2802_v5, %v2806_v52 }
 0x16a   : > { %v1079_v11 = vpop.permute.xlu0 %1078  ;;  %v1107_v30 = vsel %vm1106_vm1, %v1075_v16, %v1077_v46  ;;  %v1139_v26 = vsel %vm1106_vm1, %v1077_v46, %v1075_v16 }
 0x16b   : > { %1201 = vrot.lane.b32.xlu1 %v2754_v32, %s2376_s15  ;;  %1587 = vmatprep.subr.bf16.mxu0 %v1471_v47  ;;  %v1155_v53 = vmul.f32 %v2970_v45, %v1107_v30  ;;  %v1156_v54 = vmul.f32 %v2967_v44, %v1139_v26 }
 0x16c   : > { %888 = vrot.lane.b32.xlu0 %v2774_v42, %s2375_s28  ;;  %1588 = vmatpush1.bf16.msra.mxu0 %v1470_v8  ;;  %v3140_v8 = vpack.c.bf16 %v2800_v50, %v2804_v51 }
 0x16d   : > { %v1081_v25 = vpop.permute.xlu1 %1080 }
 0x16e   : > { %v1108_v48 = vsel %vm1106_vm1, %v1079_v11, %v1081_v25  ;;  %v1140_v2 = vsel %vm1106_vm1, %v1081_v25, %v1079_v11  ;;  %v691_v49 = vpop.permute.xlu0 %690 }
 0x16f   : > { %v1157_v55 = vmul.f32 %v2970_v45, %v1108_v48  ;;  %v1158_v36 = vmul.f32 %v2967_v44, %v1140_v2  ;;  %890 = vrot.lane.b32.xlu1 %v2770_v40, %s2375_s28  ;;  %v3093_v44 = vpack.c.bf16 %v2754_v32, %v2737_v21  ;;  %v3152_v48 = vpack.c.bf16 %v2834_v63, %v2838_v4 }
 0x170   : > { %912 = vrot.lane.b32.xlu0 %v2772_v41, %s2375_s28 }
 0x171   : > { %v693_v56 = vpop.permute.xlu1 %692  ;;  %v1503_v62 = vpack.c.bf16 %v1158_v36, %v1156_v54  ;;  %v1502_v1 = vpack.c.bf16 %v1157_v55, %v1155_v53  ;;  %v3160_v54 = vpack.c.bf16 %v2832_v60, %v2836_v3 }
 0x172   : > { %v723_v57 = vpop.permute.xlu0 %722 }
 0x173   : > { %914 = vrot.lane.b32.xlu1 %v2768_v39, %s2375_s28  ;;  %1630 = vmatprep.subr.bf16.mxu1 %v1503_v62  ;;  %v733_v45 = vsel %vm726_vm2, %v723_v57, %v691_v49  ;;  %v757_v59 = vsel %vm726_vm2, %v691_v49, %v723_v57 }
 0x174   : > { %1187 = vrot.lane.b32.xlu0 %v2772_v41, %s2376_s15  ;;  %1631 = vmatpush1.bf16.msra.mxu1 %v1502_v1  ;;  %v779_v28 = vmul.f32 %v3084_v58, %v757_v59  ;;  %v780_v20 = vmul.f32 %v3087_v61, %v733_v45 }
 0x175   : > { %v725_v6 = vpop.permute.xlu1 %724  ;;  %1632 = vmatprep.subr.bf16.mxu1 %v3093_v44 }
 0x176   : > { %v734_v9 = vsel %vm726_vm2, %v725_v6, %v693_v56  ;;  %v758_v10 = vsel %vm726_vm2, %v693_v56, %v725_v6  ;;  %v687_v15 = vpop.permute.xlu0 %686 }
 0x177   : > { %v781_v23 = vmul.f32 %v3084_v58, %v758_v10  ;;  %v782_v33 = vmul.f32 %v3087_v61, %v734_v9  ;;  %1189 = vrot.lane.b32.xlu1 %v2774_v42, %s2376_s15 }
 0x178   : > { %1191 = vrot.lane.b32.xlu0 %v2768_v39, %s2376_s15  ;;  %1633 = vmatpush1.bf16.msra.mxu1 %v3104_v22 }
 0x179   : > { %v689_v34 = vpop.permute.xlu1 %688  ;;  %1634 = vmatprep.subr.bf16.mxu1 %v3108_v27  ;;  %v1469_v37 = vpack.c.bf16 %v782_v33, %v780_v20  ;;  %v1468_v14 = vpack.c.bf16 %v781_v23, %v779_v28 }
 0x17a   : > { %v719_v17 = vpop.permute.xlu0 %718 }
 0x17b   : > { %1193 = vrot.lane.b32.xlu1 %v2770_v40, %s2376_s15  ;;  %1589 = vmatprep.subr.bf16.mxu0 %v1469_v37  ;;  %v731_v16 = vsel %vm726_vm2, %v719_v17, %v687_v15  ;;  %v755_v24 = vsel %vm726_vm2, %v687_v15, %v719_v17  ;;  %v2203_v37 = vld [vmem:[%s3673_s3 + $0x4] ss:$20 sps:$4 sm:$0xff]  }
 0x17c   : > { %884 = vrot.lane.b32.xlu0 %v2806_v52, %s2375_s28  ;;  %1590 = vmatpush1.bf16.msra.mxu0 %v1468_v14  ;;  %v775_v11 = vmul.f32 %v3084_v58, %v755_v24  ;;  %v776_v30 = vmul.f32 %v3087_v61, %v731_v16 }
 0x17d   : > { %1635 = vmatpush1.bf16.msra.mxu1 %v3124_v19  ;;  %v721_v29 = vpop.permute.xlu1 %720  ;;  %1613 = vmatprep.mubr.bf16.mxu0 %v2203_v37 }
 0x17e   : > { %v732_v43 = vsel %vm726_vm2, %v721_v29, %v689_v34  ;;  %v756_v46 = vsel %vm726_vm2, %v689_v34, %v721_v29  ;;  %1636 = vmatprep.subr.bf16.mxu1 %v3132_v38  ;;  %v683_v47 = vpop.permute.xlu0 %682  ;;  %v1052_v29 = vsub.s32 3, %v2922_v7 }
 0x17f   : > { %v777_v26 = vmul.f32 %v3084_v58, %v756_v46  ;;  %v778_v25 = vmul.f32 %v3087_v61, %v732_v43  ;;  %886 = vrot.lane.b32.xlu1 %v2802_v5, %s2375_s28 }
 0x180   : > { %908 = vrot.lane.b32.xlu0 %v2804_v51, %s2375_s28 }
 0x181   : > { %1637 = vmatpush1.bf16.msra.mxu1 %v3140_v8  ;;  %v685_v2 = vpop.permute.xlu1 %684  ;;  %v1467_v49 = vpack.c.bf16 %v778_v25, %v776_v30  ;;  %v1466_v35 = vpack.c.bf16 %v777_v26, %v775_v11  ;;  %v3198_v25 = vrot.slane %v2939_v13, %v1052_v29 }
 0x182   : > { %1638 = vmatprep.subr.bf16.mxu1 %v3152_v48  ;;  %v715_v53 = vpop.permute.xlu0 %714 }
 0x183   : > { %910 = vrot.lane.b32.xlu1 %v2800_v50, %s2375_s28  ;;  %1591 = vmatprep.subr.bf16.mxu0 %v1467_v49  ;;  %v729_v55 = vsel %vm726_vm2, %v715_v53, %v683_v47  ;;  %v753_v36 = vsel %vm726_vm2, %v683_v47, %v715_v53  ;;  %v3201_v49 = vrot.slane %v2934_v12, %v1052_v29  ;;  %v2206_v53 = vld [vmem:[%s3673_s3 + $0xc] ss:$20 sps:$4 sm:$0xff]  }
 0x184   : > { %1179 = vrot.lane.b32.xlu0 %v2804_v51, %s2376_s15  ;;  %1592 = vmatpush1.bf16.msra.mxu0 %v1466_v35  ;;  %v771_v45 = vmul.f32 %v3084_v58, %v753_v36  ;;  %v772_v59 = vmul.f32 %v3087_v61, %v729_v55 }
 0x185   : > { %1639 = vmatpush1.bf16.msra.mxu1 %v3160_v54  ;;  %v717_v56 = vpop.permute.xlu1 %716  ;;  %1656 = vmatprep.mubr.bf16.mxu1 %v2206_v53 }
 0x186   : > { %v730_v62 = vsel %vm726_vm2, %v717_v56, %v685_v2  ;;  %v754_v1 = vsel %vm726_vm2, %v685_v2, %v717_v56  ;;  %v679_v57 = vpop.permute.xlu0 %678 }
 0x187   : > { %v773_v6 = vmul.f32 %v3084_v58, %v754_v1  ;;  %v774_v9 = vmul.f32 %v3087_v61, %v730_v62  ;;  %1181 = vrot.lane.b32.xlu1 %v2806_v52, %s2376_s15 }
 0x188   : > { %1183 = vrot.lane.b32.xlu0 %v2800_v50, %s2376_s15 }
 0x189   : > { %v681_v10 = vpop.permute.xlu1 %680  ;;  %v1465_v15 = vpack.c.bf16 %v774_v9, %v772_v59  ;;  %v1464_v28 = vpack.c.bf16 %v773_v6, %v771_v45  ;;  %v1343_v59 = vsub.s32 7, %v2922_v7 }
 0x18a   : > { %v711_v20 = vpop.permute.xlu0 %710 }
 0x18b   : > { %v751_v23 = vsel %vm726_vm2, %v679_v57, %v711_v20  ;;  %1185 = vrot.lane.b32.xlu1 %v2802_v5, %s2376_s15  ;;  %1593 = vmatprep.subr.bf16.mxu0 %v1465_v15  ;;  %v727_v33 = vsel %vm726_vm2, %v711_v20, %v679_v57  ;;  %v3227_v20 = vrot.slane %v2934_v12, %v1343_v59 }
 0x18c   : > { %880 = vrot.lane.b32.xlu0 %v2838_v4, %s2375_s28  ;;  %1594 = vmatpush1.bf16.msra.mxu0 %v1464_v28  ;;  %v767_v14 = vmul.f32 %v3084_v58, %v751_v23  ;;  %v768_v43 = vmul.f32 %v3087_v61, %v727_v33  ;;  %v3224_v28 = vrot.slane %v2939_v13, %v1343_v59 }
 0x18d   : > { %v713_v34 = vpop.permute.xlu1 %712 }
 0x18e   : > { %v728_v17 = vsel %vm726_vm2, %v713_v34, %v681_v10  ;;  %v752_v16 = vsel %vm726_vm2, %v681_v10, %v713_v34  ;;  %v990_v24 = vpop.permute.xlu0 %989 }
 0x18f   : > { %v769_v46 = vmul.f32 %v3084_v58, %v752_v16  ;;  %v770_v47 = vmul.f32 %v3087_v61, %v728_v17  ;;  %882 = vrot.lane.b32.xlu1 %v2834_v63, %s2375_s28 }
 0x190   : > { %904 = vrot.lane.b32.xlu0 %v2836_v3, %s2375_s28 }
 0x191   : > { %v992_v11 = vpop.permute.xlu1 %991  ;;  %v1463_v30 = vpack.c.bf16 %v770_v47, %v768_v43  ;;  %v1462_v26 = vpack.c.bf16 %v769_v46, %v767_v14 }
 0x192   : > { %v1014_v2 = vpop.permute.xlu0 %1013 }
 0x193   : > { %v1048_v58 = vsel %vm1017_vm3, %v990_v24, %v1014_v2  ;;  %906 = vrot.lane.b32.xlu1 %v2832_v60, %s2375_s28  ;;  %1595 = vmatprep.subr.bf16.mxu0 %v1463_v30  ;;  %v1024_v61 = vsel %vm1017_vm3, %v1014_v2, %v990_v24 }
 0x194   : > { %1171 = vrot.lane.b32.xlu0 %v2836_v3, %s2376_s15  ;;  %1596 = vmatpush1.bf16.msra.mxu0 %v1462_v26  ;;  %v1070_v55 = vmul.f32 %v3198_v25, %v1048_v58  ;;  %v1071_v1 = vmul.f32 %v3201_v49, %v1024_v61 }
 0x195   : > { %v1016_v35 = vpop.permute.xlu1 %1015 }
 0x196   : > { %v1025_v36 = vsel %vm1017_vm3, %v1016_v35, %v992_v11  ;;  %v1049_v56 = vsel %vm1017_vm3, %v992_v11, %v1016_v35  ;;  %v1293_v62 = vpop.permute.xlu0 %1292 }
 0x197   : > { %v1072_v57 = vmul.f32 %v3198_v25, %v1049_v56  ;;  %v1073_v45 = vmul.f32 %v3201_v49, %v1025_v36  ;;  %1173 = vrot.lane.b32.xlu1 %v2838_v4, %s2376_s15 }
 0x198   : > { %1175 = vrot.lane.b32.xlu0 %v2832_v60, %s2376_s15 }
 0x199   : > { %v1295_v6 = vpop.permute.xlu1 %1294  ;;  %v1493_v9 = vpack.c.bf16 %v1073_v45, %v1071_v1  ;;  %v1492_v10 = vpack.c.bf16 %v1072_v57, %v1070_v55 }
 0x19a   : > { %v1297_v15 = vpop.permute.xlu0 %1296  ;;  %v1307_v23 = vsel %vm1300_vm4, %v1293_v62, %v1295_v6  ;;  %v1339_v33 = vsel %vm1300_vm4, %v1295_v6, %v1293_v62 }
 0x19b   : > { %1177 = vrot.lane.b32.xlu1 %v2834_v63, %s2376_s15  ;;  %1597 = vmatprep.subr.bf16.mxu0 %v1493_v9  ;;  %v1361_v16 = vmul.f32 %v3224_v28, %v1307_v23  ;;  %v1362_v24 = vmul.f32 %v3227_v20, %v1339_v33 }
 0x19c   : > { %1389 = vrot.lane.b32.xlu0 %v2735_v18, %s2377_s21  ;;  %1598 = vmatpush2.bf16.msra.mxu0 %v1492_v10 }
 0x19d   : > { %v1299_v34 = vpop.permute.xlu1 %1298 }
 0x19e   : > { %v1308_v37 = vsel %vm1300_vm4, %v1297_v15, %v1299_v34  ;;  %v1340_v14 = vsel %vm1300_vm4, %v1299_v34, %v1297_v15  ;;  %v986_v17 = vpop.permute.xlu0 %985 }
 0x19f   : > { %v1363_v29 = vmul.f32 %v3224_v28, %v1308_v37  ;;  %v1364_v43 = vmul.f32 %v3227_v20, %v1340_v14  ;;  %1391 = vrot.lane.b32.xlu1 %v2737_v21, %s2377_s21 }
 0x1a0   : > { %1393 = vrot.lane.b32.xlu0 %v2752_v31, %s2377_s21 }
 0x1a1   : > { %v988_v18 = vpop.permute.xlu1 %987  ;;  %v1525_v46 = vpack.c.bf16 %v1364_v43, %v1362_v24  ;;  %v1524_v47 = vpack.c.bf16 %v1363_v29, %v1361_v16  ;;  %v1540_v29 = vld [vmem:[%s3674_s4] sm:$0xff] }
 0x1a2   : > { %v1010_v11 = vpop.permute.xlu0 %1009 }
 0x1a3   : > { %1395 = vrot.lane.b32.xlu1 %v2754_v32, %s2377_s21  ;;  %1640 = vmatprep.subr.bf16.mxu1 %v1525_v46  ;;  %v1022_v30 = vsel %vm1017_vm3, %v1010_v11, %v986_v17  ;;  %v1046_v26 = vsel %vm1017_vm3, %v986_v17, %v1010_v11 }
 0x1a4   : > { %1381 = vrot.lane.b32.xlu0 %v2772_v41, %s2377_s21  ;;  %1641 = vmatpush2.bf16.msra.mxu1 %v1524_v47  ;;  %v1066_v61 = vmul.f32 %v3198_v25, %v1046_v26  ;;  %v1067_v35 = vmul.f32 %v3201_v49, %v1022_v30  ;;  %v1718_v30 = vld [vmem:[%s3676_s6] sm:$0xff] }
 0x1a5   : > { %v1012_v21 = vpop.permute.xlu1 %1011 }
 0x1a6   : > { %v1023_v2 = vsel %vm1017_vm3, %v1012_v21, %v988_v18  ;;  %v1047_v31 = vsel %vm1017_vm3, %v988_v18, %v1012_v21  ;;  %v1285_v58 = vpop.permute.xlu0 %1284 }
 0x1a7   : > { %v1068_v32 = vmul.f32 %v3198_v25, %v1047_v31  ;;  %v1069_v53 = vmul.f32 %v3201_v49, %v1023_v2  ;;  %1383 = vrot.lane.b32.xlu1 %v2774_v42, %s2377_s21 }
 0x1a8   : > { %1385 = vrot.lane.b32.xlu0 %v2768_v39, %s2377_s21 }
 0x1a9   : > { %v1287_v41 = vpop.permute.xlu1 %1286  ;;  %v1491_v55 = vpack.c.bf16 %v1069_v53, %v1067_v35  ;;  %v1490_v36 = vpack.c.bf16 %v1068_v32, %v1066_v61  ;;  %v1719_v35 = vld [vmem:[%s3676_s6 + $0x8] sm:$0xff]  ;;  %v1720_v53 = vld [vmem:[%s3676_s6 + $0x10] sm:$0xff] }
 0x1aa   : > { %v1289_v56 = vpop.permute.xlu0 %1288  ;;  %v1305_v62 = vsel %vm1300_vm4, %v1285_v58, %v1287_v41  ;;  %v1337_v1 = vsel %vm1300_vm4, %v1287_v41, %v1285_v58 }
 0x1ab   : > { %1387 = vrot.lane.b32.xlu1 %v2770_v40, %s2377_s21  ;;  %1599 = vmatprep.subr.bf16.mxu0 %v1491_v55  ;;  %v1357_v59 = vmul.f32 %v3224_v28, %v1305_v62  ;;  %v1358_v6 = vmul.f32 %v3227_v20, %v1337_v1  ;;  %v1721_v1 = vld [vmem:[%s3676_s6 + $0x18] sm:$0xff] }
 0x1ac   : > { %1373 = vrot.lane.b32.xlu0 %v2804_v51, %s2377_s21  ;;  %1600 = vmatpush2.bf16.msra.mxu0 %v1490_v36 }
 0x1ad   : > { %v1291_v42 = vpop.permute.xlu1 %1290 }
 0x1ae   : > { %v1306_v57 = vsel %vm1300_vm4, %v1289_v56, %v1291_v42  ;;  %v1338_v39 = vsel %vm1300_vm4, %v1291_v42, %v1289_v56  ;;  %v982_v45 = vpop.permute.xlu0 %981 }
 0x1af   : > { %v1359_v40 = vmul.f32 %v3224_v28, %v1306_v57  ;;  %v1360_v9 = vmul.f32 %v3227_v20, %v1338_v39  ;;  %1375 = vrot.lane.b32.xlu1 %v2806_v52, %s2377_s21  ;;  %v1722_v57 = vld [vmem:[%s3676_s6 + $0x20] sm:$0xff] }
 0x1b0   : > { %1377 = vrot.lane.b32.xlu0 %v2800_v50, %s2377_s21 }
 0x1b1   : > { %v984_v51 = vpop.permute.xlu1 %983  ;;  %v1523_v10 = vpack.c.bf16 %v1360_v9, %v1358_v6  ;;  %v1522_v15 = vpack.c.bf16 %v1359_v40, %v1357_v59 }
 0x1b2   : > { %v1006_v23 = vpop.permute.xlu0 %1005 }
 0x1b3   : > { %1379 = vrot.lane.b32.xlu1 %v2802_v5, %s2377_s21  ;;  %1642 = vmatprep.subr.bf16.mxu1 %v1523_v10  ;;  %v1020_v33 = vsel %vm1017_vm3, %v1006_v23, %v982_v45  ;;  %v1044_v34 = vsel %vm1017_vm3, %v982_v45, %v1006_v23  ;;  %v1723_v10 = vld [vmem:[%s3676_s6 + $0x28] sm:$0xff]  ;;  %v1724_v23 = vld [vmem:[%s3676_s6 + $0x30] sm:$0xff] }
 0x1b4   : > { %1365 = vrot.lane.b32.xlu0 %v2836_v3, %s2377_s21  ;;  %1643 = vmatpush2.bf16.msra.mxu1 %v1522_v15  ;;  %v1062_v17 = vmul.f32 %v3198_v25, %v1044_v34  ;;  %v1063_v16 = vmul.f32 %v3201_v49, %v1020_v33 }
 0x1b5   : > { %v1008_v52 = vpop.permute.xlu1 %1007 }
 0x1b6   : > { %v1021_v37 = vsel %vm1017_vm3, %v1008_v52, %v984_v51  ;;  %v1045_v50 = vsel %vm1017_vm3, %v984_v51, %v1008_v52  ;;  %v1277_v14 = vpop.permute.xlu0 %1276 }
 0x1b7   : > { %v1064_v5 = vmul.f32 %v3198_v25, %v1045_v50  ;;  %v1065_v24 = vmul.f32 %v3201_v49, %v1021_v37  ;;  %1367 = vrot.lane.b32.xlu1 %v2838_v4, %s2377_s21  ;;  %v1725_v37 = vld [vmem:[%s3676_s6 + $0x38] sm:$0xff] }
 0x1b8   : > { %1369 = vrot.lane.b32.xlu0 %v2832_v60, %s2377_s21  ;;  %v1541_v60 = vld [vmem:[%s3674_s4 + $0x8] sm:$0xff] }
 0x1b9   : > { %v1279_v3 = vpop.permute.xlu1 %1278  ;;  %v1489_v43 = vpack.c.bf16 %v1065_v24, %v1063_v16  ;;  %v1488_v18 = vpack.c.bf16 %v1064_v5, %v1062_v17  ;;  %v955_v5 = vsub.s32 2, %v2922_v7 }
 0x1ba   : > { %v1281_v46 = vpop.permute.xlu0 %1280  ;;  %v1303_v47 = vsel %vm1300_vm4, %v1277_v14, %v1279_v3  ;;  %v1335_v11 = vsel %vm1300_vm4, %v1279_v3, %v1277_v14 }
 0x1bb   : > { %1371 = vrot.lane.b32.xlu1 %v2834_v63, %s2377_s21  ;;  %1601 = vmatprep.subr.bf16.mxu0 %v1489_v43  ;;  %v1353_v2 = vmul.f32 %v3224_v28, %v1303_v47  ;;  %v1354_v31 = vmul.f32 %v3227_v20, %v1335_v11  ;;  %s1915_s21 = sshll.u32 %s2740_s30, 4  ;;  %s2250_s30 = scalar_lea.vmem %s2249_s22, 4096  ;;  %s3525_s21 = int_to_ptr.vmem [resolvable:$true] %s1915_s21 }
 0x1bc   : > { %1544 = vperm.xlu0 %2199, %v1540_v29   ;;  %1602 = vmatpush2.bf16.msra.mxu0 %v1488_v18  ;;  %s2244_s15 = scalar_lea.vmem %s3525_s21, 2048  ;;  %p2251_p5 = scmp.lt.s32.totalorder %s3525_s21, %s2249_s22 }
 0x1bd   : > { %v1283_v4 = vpop.permute.xlu1 %1282  ;;  %p2245_p11 = scmp.ne.s32.totalorder %s3525_s21, %s2244_s15  ;;  %p2252_p7 = scmp.lt.s32.totalorder %s2250_s30, %s2244_s15 }
 0x1be   : > { %v1304_v26 = vsel %vm1300_vm4, %v1281_v46, %v1283_v4  ;;  %v1336_v63 = vsel %vm1300_vm4, %v1283_v4, %v1281_v46  ;;  %v978_v21 = vpop.permute.xlu0 %977  ;;  %v3354_v4 = vrot.slane %v2934_v12, %v955_v5 }
 0x1bf   : > { %v1355_v58 = vmul.f32 %v3224_v28, %v1304_v26  ;;  %v1356_v61 = vmul.f32 %v3227_v20, %v1336_v63  ;;  %1549 = vperm.xlu1 %2200, %v1541_v60   ;;  %v3351_v60 = vrot.slane %v2939_v13, %v955_v5  ;;  %p2246_p13 = pnand %p2245_p11, %p3699_p12  ;;  %p2253_p8 = por %p2252_p7, %p2251_p5 }
 0x1c0   : > { %1728 = vperm.xlu0 %2199, %v1718_v30  }
 0x1c1   : > { %v980_v32 = vpop.permute.xlu1 %979  ;;  %v1521_v41 = vpack.c.bf16 %v1356_v61, %v1354_v31  ;;  %v1520_v55 = vpack.c.bf16 %v1355_v58, %v1353_v2  ;;  %v1246_v2 = vsub.s32 6, %v2922_v7  ;;  %p2247_p4 = pneg %p2246_p13 }
 0x1c2   : > { %v1002_v36 = vpop.permute.xlu0 %1001 }
 0x1c3   : > { %1733 = vperm.xlu1 %2200, %v1719_v35   ;;  %1644 = vmatprep.subr.bf16.mxu1 %v1521_v41  ;;  %v1018_v56 = vsel %vm1017_vm3, %v1002_v36, %v978_v21  ;;  %v1042_v62 = vsel %vm1017_vm3, %v978_v21, %v1002_v36  ;;  %v3366_v36 = vrot.slane %v2939_v13, %v1246_v2  ;;  %p2254_p10 = pnand %p2253_p8, %p2247_p4 }
 0x1c4   : > { %1738 = vperm.xlu0 %2199, %v1720_v53   ;;  %1645 = vmatpush2.bf16.msra.mxu1 %v1520_v55  ;;  %v1058_v6 = vmul.f32 %v3198_v25, %v1042_v62  ;;  %v1059_v40 = vmul.f32 %v3201_v49, %v1018_v56  ;;  %v3369_v56 = vrot.slane %v2934_v12, %v1246_v2 }
 0x1c5   : > { %v1004_v42 = vpop.permute.xlu1 %1003 }
 0x1c6   : > { %v1019_v39 = vsel %vm1017_vm3, %v1004_v42, %v980_v32  ;;  %v1043_v45 = vsel %vm1017_vm3, %v980_v32, %v1004_v42  ;;  %v1269_v59 = vpop.permute.xlu0 %1268 }
 0x1c7   : > { %v1060_v9 = vmul.f32 %v3198_v25, %v1043_v45  ;;  %v1061_v51 = vmul.f32 %v3201_v49, %v1019_v39  ;;  %1743 = vperm.xlu1 %2200, %v1721_v1  }
 0x1c8   : > { %1748 = vperm.xlu0 %2199, %v1722_v57  }
 0x1c9   : > { %v1271_v15 = vpop.permute.xlu1 %1270  ;;  %v1487_v33 = vpack.c.bf16 %v1061_v51, %v1059_v40  ;;  %v1486_v34 = vpack.c.bf16 %v1060_v9, %v1058_v6 }
 0x1ca   : > { %v1273_v52 = vpop.permute.xlu0 %1272  ;;  %v1301_v25 = vsel %vm1300_vm4, %v1269_v59, %v1271_v15  ;;  %v1333_v49 = vsel %vm1300_vm4, %v1271_v15, %v1269_v59 }
 0x1cb   : > { %1753 = vperm.xlu1 %2200, %v1723_v10   ;;  %1603 = vmatprep.subr.bf16.mxu0 %v1487_v33  ;;  %v1349_v24 = vmul.f32 %v3224_v28, %v1301_v25  ;;  %v1350_v3 = vmul.f32 %v3227_v20, %v1333_v49 }
 0x1cc   : > { %1758 = vperm.xlu0 %2199, %v1724_v23   ;;  %1604 = vmatpush2.bf16.msra.mxu0 %v1486_v34 }
 0x1cd   : > { %v1275_v50 = vpop.permute.xlu1 %1274 }
 0x1ce   : > { %v1302_v14 = vsel %vm1300_vm4, %v1273_v52, %v1275_v50  ;;  %v1334_v17 = vsel %vm1300_vm4, %v1275_v50, %v1273_v52  ;;  %v893_v16 = vpop.permute.xlu0 %892 }
 0x1cf   : > { %v1351_v29 = vmul.f32 %v3224_v28, %v1302_v14  ;;  %v1352_v43 = vmul.f32 %v3227_v20, %v1334_v17  ;;  %1763 = vperm.xlu1 %2200, %v1725_v37  }
 0x1d1   : > { %v895_v18 = vpop.permute.xlu1 %894  ;;  %v1519_v46 = vpack.c.bf16 %v1352_v43, %v1350_v3  ;;  %v1518_v47 = vpack.c.bf16 %v1351_v29, %v1349_v24 }
 0x1d2   : > { %v917_v11 = vpop.permute.xlu0 %916 }
 0x1d3   : > { %1646 = vmatprep.subr.bf16.mxu1 %v1519_v46  ;;  %v927_v30 = vsel %vm920_vm5, %v917_v11, %v893_v16  ;;  %v951_v26 = vsel %vm920_vm5, %v893_v16, %v917_v11 }
 0x1d4   : > { %1647 = vmatpush2.bf16.msra.mxu1 %v1518_v47  ;;  %v973_v31 = vmul.f32 %v3351_v60, %v951_v26  ;;  %v974_v58 = vmul.f32 %v3354_v4, %v927_v30 }
 0x1d5   : > { %v919_v28 = vpop.permute.xlu1 %918 }
 0x1d6   : > { %v928_v20 = vsel %vm920_vm5, %v919_v28, %v895_v18  ;;  %v952_v63 = vsel %vm920_vm5, %v895_v18, %v919_v28  ;;  %v1196_v21 = vpop.permute.xlu0 %1195 }
 0x1d7   : > { %v975_v61 = vmul.f32 %v3351_v60, %v952_v63  ;;  %v976_v35 = vmul.f32 %v3354_v4, %v928_v20 }
 0x1d9   : > { %v1198_v32 = vpop.permute.xlu1 %1197  ;;  %v1485_v53 = vpack.c.bf16 %v976_v35, %v974_v58  ;;  %v1484_v41 = vpack.c.bf16 %v975_v61, %v973_v31 }
 0x1da   : > { %v1200_v55 = vpop.permute.xlu0 %1199  ;;  %v1210_v7 = vsel %vm1203_vm6, %v1196_v21, %v1198_v32  ;;  %v1242_v62 = vsel %vm1203_vm6, %v1198_v32, %v1196_v21 }
 0x1db   : > { %1605 = vmatprep.subr.bf16.mxu0 %v1485_v53  ;;  %v1264_v45 = vmul.f32 %v3366_v36, %v1210_v7  ;;  %v1265_v13 = vmul.f32 %v3369_v56, %v1242_v62 }
 0x1dc   : > { %1606 = vmatpush2.bf16.msra.mxu0 %v1484_v41 }
 0x1dd   : > { %v1202_v1 = vpop.permute.xlu1 %1201 }
 0x1de   : > { %v1211_v42 = vsel %vm1203_vm6, %v1200_v55, %v1202_v1  ;;  %v1243_v57 = vsel %vm1203_vm6, %v1202_v1, %v1200_v55  ;;  %v889_v39 = vpop.permute.xlu0 %888 }
 0x1df   : > { %v1266_v59 = vmul.f32 %v3366_v36, %v1211_v42  ;;  %v1267_v12 = vmul.f32 %v3369_v56, %v1243_v57 }
 0x1e1   : > { %v891_v6 = vpop.permute.xlu1 %890  ;;  %v1517_v40 = vpack.c.bf16 %v1267_v12, %v1265_v13  ;;  %v1516_v9 = vpack.c.bf16 %v1266_v59, %v1264_v45 }
 0x1e2   : > { %v913_v51 = vpop.permute.xlu0 %912 }
 0x1e3   : > { %1648 = vmatprep.subr.bf16.mxu1 %v1517_v40  ;;  %v925_v10 = vsel %vm920_vm5, %v913_v51, %v889_v39  ;;  %v949_v15 = vsel %vm920_vm5, %v889_v39, %v913_v51 }
 0x1e4   : > { %1649 = vmatpush2.bf16.msra.mxu1 %v1516_v9  ;;  %v969_v25 = vmul.f32 %v3351_v60, %v949_v15  ;;  %v970_v49 = vmul.f32 %v3354_v4, %v925_v10 }
 0x1e5   : > { %v915_v23 = vpop.permute.xlu1 %914 }
 0x1e6   : > { %v926_v33 = vsel %vm920_vm5, %v915_v23, %v891_v6  ;;  %v950_v34 = vsel %vm920_vm5, %v891_v6, %v915_v23  ;;  %v1188_v52 = vpop.permute.xlu0 %1187 }
 0x1e7   : > { %v971_v37 = vmul.f32 %v3351_v60, %v950_v34  ;;  %v972_v50 = vmul.f32 %v3354_v4, %v926_v33 }
 0x1e9   : > { %v1190_v14 = vpop.permute.xlu1 %1189  ;;  %v1483_v17 = vpack.c.bf16 %v972_v50, %v970_v49  ;;  %v1482_v16 = vpack.c.bf16 %v971_v37, %v969_v25 }
 0x1ea   : > { %v1192_v5 = vpop.permute.xlu0 %1191  ;;  %v1208_v24 = vsel %vm1203_vm6, %v1188_v52, %v1190_v14  ;;  %v1240_v3 = vsel %vm1203_vm6, %v1190_v14, %v1188_v52 }
 0x1eb   : > { %1607 = vmatprep.subr.bf16.mxu0 %v1483_v17  ;;  %v1260_v47 = vmul.f32 %v3366_v36, %v1208_v24  ;;  %v1261_v11 = vmul.f32 %v3369_v56, %v1240_v3 }
 0x1ec   : > { %1608 = vmatpush2.bf16.msra.mxu0 %v1482_v16 }
 0x1ed   : > { %v1194_v29 = vpop.permute.xlu1 %1193 }
 0x1ee   : > { %v1209_v43 = vsel %vm1203_vm6, %v1192_v5, %v1194_v29  ;;  %v1241_v18 = vsel %vm1203_vm6, %v1194_v29, %v1192_v5  ;;  %v885_v46 = vpop.permute.xlu0 %884 }
 0x1ef   : > { %v1262_v30 = vmul.f32 %v3366_v36, %v1209_v43  ;;  %v1263_v26 = vmul.f32 %v3369_v56, %v1241_v18 }
 0x1f1   : > { %v887_v28 = vpop.permute.xlu1 %886  ;;  %v1515_v20 = vpack.c.bf16 %v1263_v26, %v1261_v11  ;;  %v1514_v63 = vpack.c.bf16 %v1262_v30, %v1260_v47 }
 0x1f2   : > { %v909_v21 = vpop.permute.xlu0 %908 }
 0x1f3   : > { %1650 = vmatprep.subr.bf16.mxu1 %v1515_v20  ;;  %v923_v2 = vsel %vm920_vm5, %v909_v21, %v885_v46  ;;  %v947_v31 = vsel %vm920_vm5, %v885_v46, %v909_v21  ;;  %v2201_v46 = vld [vmem:[%s3673_s3] ss:$20 sps:$4 sm:$0xff]  }
 0x1f4   : > { %1651 = vmatpush2.bf16.msra.mxu1 %v1514_v63  ;;  %v965_v53 = vmul.f32 %v3351_v60, %v947_v31  ;;  %v966_v41 = vmul.f32 %v3354_v4, %v923_v2 }
 0x1f5   : > { %v911_v58 = vpop.permute.xlu1 %910 }
 0x1f6   : > { %v924_v61 = vsel %vm920_vm5, %v911_v58, %v887_v28  ;;  %v948_v35 = vsel %vm920_vm5, %v887_v28, %v911_v58  ;;  %v1180_v32 = vpop.permute.xlu0 %1179 }
 0x1f7   : > { %v967_v55 = vmul.f32 %v3351_v60, %v948_v35  ;;  %v968_v7 = vmul.f32 %v3354_v4, %v924_v61  ;;  %v2204_v35 = vld [vmem:[%s3673_s3 + $0x8] ss:$20 sps:$4 sm:$0xff]  }
 0x1f9   : > { %v1182_v62 = vpop.permute.xlu1 %1181  ;;  %v1481_v1 = vpack.c.bf16 %v968_v7, %v966_v41  ;;  %v1480_v42 = vpack.c.bf16 %v967_v55, %v965_v53 }
 0x1fa   : > { %v1184_v57 = vpop.permute.xlu0 %1183  ;;  %v1206_v39 = vsel %vm1203_vm6, %v1180_v32, %v1182_v62  ;;  %v1238_v45 = vsel %vm1203_vm6, %v1182_v62, %v1180_v32  ;;  %v3437_v32 = vld [vmem:[%s3677_s7 + $0x10] ss:$0 sm:$0xff] }
 0x1fb   : > { %1609 = vmatprep.subr.bf16.mxu0 %v1481_v1  ;;  %v1256_v40 = vmul.f32 %v3366_v36, %v1206_v39  ;;  %v1257_v9 = vmul.f32 %v3369_v56, %v1238_v45 }
 0x1fc   : > { %1610 = vmatpush2.bf16.msra.mxu0 %v1480_v42 }
 0x1fd   : > { %v1186_v13 = vpop.permute.xlu1 %1185 }
 0x1fe   : > { %v1207_v59 = vsel %vm1203_vm6, %v1184_v57, %v1186_v13  ;;  %v1239_v12 = vsel %vm1203_vm6, %v1186_v13, %v1184_v57  ;;  %v881_v6 = vpop.permute.xlu0 %880 }
 0x1ff   : > { %v1258_v51 = vmul.f32 %v3366_v36, %v1207_v59  ;;  %v1259_v10 = vmul.f32 %v3369_v56, %v1239_v12 }
 0x201   : > { %v883_v15 = vpop.permute.xlu1 %882  ;;  %v1513_v23 = vpack.c.bf16 %v1259_v10, %v1257_v9  ;;  %v1512_v33 = vpack.c.bf16 %v1258_v51, %v1256_v40 }
 0x202   : > { %v905_v34 = vpop.permute.xlu0 %904 }
 0x203   : > { %1652 = vmatprep.subr.bf16.mxu1 %v1513_v23  ;;  %v921_v52 = vsel %vm920_vm5, %v905_v34, %v881_v6  ;;  %v945_v25 = vsel %vm920_vm5, %v881_v6, %v905_v34 }
 0x204   : > { %1653 = vmatpush2.bf16.msra.mxu1 %v1512_v33  ;;  %v961_v17 = vmul.f32 %v3351_v60, %v945_v25  ;;  %v962_v16 = vmul.f32 %v3354_v4, %v921_v52 }
 0x205   : > { %v907_v49 = vpop.permute.xlu1 %906 }
 0x206   : > { %v922_v37 = vsel %vm920_vm5, %v907_v49, %v883_v15  ;;  %v946_v50 = vsel %vm920_vm5, %v883_v15, %v907_v49  ;;  %v1172_v14 = vpop.permute.xlu0 %1171 }
 0x207   : > { %v963_v5 = vmul.f32 %v3351_v60, %v946_v50  ;;  %v964_v24 = vmul.f32 %v3354_v4, %v922_v37 }
 0x209   : > { %v1174_v3 = vpop.permute.xlu1 %1173  ;;  %v1479_v29 = vpack.c.bf16 %v964_v24, %v962_v16  ;;  %v1478_v43 = vpack.c.bf16 %v963_v5, %v961_v17 }
 0x20a   : > { %v1176_v18 = vpop.permute.xlu0 %1175  ;;  %v1204_v47 = vsel %vm1203_vm6, %v1172_v14, %v1174_v3  ;;  %v1236_v11 = vsel %vm1203_vm6, %v1174_v3, %v1172_v14  ;;  %v2207_v14 = vld [vmem:[%s3675_s5 + $0x8] sm:$0xff]  }
 0x20b   : > { %1611 = vmatprep.subr.bf16.mxu0 %v1479_v29  ;;  %v1252_v28 = vmul.f32 %v3366_v36, %v1204_v47  ;;  %v1253_v20 = vmul.f32 %v3369_v56, %v1236_v11 }
 0x20c   : > { %1612 = vmatpush2.bf16.msra.mxu0 %v1478_v43 }
 0x20d   : > { %v1178_v30 = vpop.permute.xlu1 %1177 }
 0x20e   : > { %v1205_v26 = vsel %vm1203_vm6, %v1176_v18, %v1178_v30  ;;  %v1237_v60 = vsel %vm1203_vm6, %v1178_v30, %v1176_v18  ;;  %v1390_v4 = vpop.permute.xlu0 %1389 }
 0x20f   : > { %v1254_v63 = vmul.f32 %v3366_v36, %v1205_v26  ;;  %v1255_v21 = vmul.f32 %v3369_v56, %v1237_v60  ;;  %1614 = vmatmul.mubr.bf16.vlgmr.msra.gmra.mxu0 %v2201_v46  ;;  %v3442_v36 = vld [vmem:[%s3677_s7 + $0x18] ss:$0 sm:$0xff]  ;;  %v2208_v60 = vld [vmem:[%s3675_s5 + $0x10] sm:$0xff]  }
 0x210   : > { %1699 = vmatprep.mubr.bf16.mxu0 %v2369_v0 }
 0x211   : > { %v1392_v2 = vpop.permute.xlu1 %1391  ;;  %v1511_v31 = vpack.c.bf16 %v1255_v21, %v1253_v20  ;;  %v1510_v58 = vpack.c.bf16 %v1254_v63, %v1252_v28 }
 0x212   : > { %v1394_v61 = vpop.permute.xlu0 %1393  ;;  %v1404_v56 = vsel %vm1397_vm7, %v1390_v4, %v1392_v2  ;;  %v1436_v53 = vsel %vm1397_vm7, %v1392_v2, %v1390_v4 }
 0x213   : > { %1654 = vmatprep.subr.bf16.mxu1 %v1511_v31  ;;  %v1458_v1 = vmul.f32 %v3437_v32, %v1404_v56  ;;  %v1459_v42 = vmul.f32 %v3442_v36, %v1436_v53 }
 0x214   : > { %1655 = vmatpush2.bf16.msra.mxu1 %v1510_v58 }
 0x215   : > { %v1396_v41 = vpop.permute.xlu1 %1395  ;;  %2123 = vmatprep.subr.bf16.mxu1 %v3093_v44 }
 0x216   : > { %v1405_v55 = vsel %vm1397_vm7, %v1394_v61, %v1396_v41  ;;  %v1437_v7 = vsel %vm1397_vm7, %v1396_v41, %v1394_v61  ;;  %v1382_v62 = vpop.permute.xlu0 %1381  ;;  %v2209_v41 = vld [vmem:[%s3673_s3 + $0x10] ss:$20 sps:$4 sm:$0xff]  }
 0x217   : > { %v1460_v57 = vmul.f32 %v3437_v32, %v1405_v55  ;;  %v1461_v39 = vmul.f32 %v3442_v36, %v1437_v7  ;;  %1657 = vmatmul.mubr.bf16.vlgmr.msra.gmra.mxu1 %v2204_v35  ;;  %v2210_v55 = vld [vmem:[%s3675_s5 + $0x18] sm:$0xff]  }
 0x218   : > { %2127 = vmatpush1.bf16.msra.mxu1 %v3104_v22  ;;  %1840 = vmatprep.mubr.bf16.mxu1 %v2369_v0 }
 0x219   : > { %v1532_v45 = vpack.c.bf16 %v1460_v57, %v1458_v1  ;;  %v1384_v13 = vpop.permute.xlu1 %1383  ;;  %2124 = vmatprep.subr.bf16.mxu1 %v3108_v27  ;;  %v1533_v59 = vpack.c.bf16 %v1461_v39, %v1459_v42 }
 0x21a   : > { %v1386_v12 = vpop.permute.xlu0 %1385  ;;  %v1402_v6 = vsel %vm1397_vm7, %v1382_v62, %v1384_v13  ;;  %v1434_v40 = vsel %vm1397_vm7, %v1384_v13, %v1382_v62 }
 0x21b   : > { %1675 = vmatprep.subr.bf16.mxu0 %v1533_v59  ;;  %v1454_v23 = vmul.f32 %v3437_v32, %v1402_v6  ;;  %v1455_v33 = vmul.f32 %v3442_v36, %v1434_v40 }
 0x21c   : > { %1676 = vmatpush1.bf16.msra.mxu0 %v1532_v45  ;;  %2128 = vmatpush1.bf16.msra.mxu1 %v3124_v19 }
 0x21d   : > { %v1388_v9 = vpop.permute.xlu1 %1387  ;;  %2125 = vmatprep.subr.bf16.mxu1 %v3132_v38 }
 0x21e   : > { %v1403_v51 = vsel %vm1397_vm7, %v1386_v12, %v1388_v9  ;;  %v1435_v10 = vsel %vm1397_vm7, %v1388_v9, %v1386_v12  ;;  %v1374_v15 = vpop.permute.xlu0 %1373 }
 0x21f   : > { %v1456_v34 = vmul.f32 %v3437_v32, %v1403_v51  ;;  %v1457_v52 = vmul.f32 %v3442_v36, %v1435_v10 }
 0x220   : > { %2129 = vmatpush1.bf16.msra.mxu1 %v3140_v8 }
 0x221   : > { %v1530_v25 = vpack.c.bf16 %v1456_v34, %v1454_v23  ;;  %v1376_v49 = vpop.permute.xlu1 %1375  ;;  %2126 = vmatprep.subr.bf16.mxu1 %v3152_v48  ;;  %v1531_v37 = vpack.c.bf16 %v1457_v52, %v1455_v33 }
 0x222   : > { %v1378_v50 = vpop.permute.xlu0 %1377  ;;  %v1400_v17 = vsel %vm1397_vm7, %v1374_v15, %v1376_v49  ;;  %v1432_v16 = vsel %vm1397_vm7, %v1376_v49, %v1374_v15 }
 0x223   : > { %1677 = vmatprep.subr.bf16.mxu0 %v1531_v37  ;;  %v1450_v29 = vmul.f32 %v3437_v32, %v1400_v17  ;;  %v1451_v43 = vmul.f32 %v3442_v36, %v1432_v16 }
 0x224   : > { %1678 = vmatpush1.bf16.msra.mxu0 %v1530_v25  ;;  %2130 = vmatpush1.bf16.msra.mxu1 %v3160_v54 }
 0x225   : > { %v1380_v5 = vpop.permute.xlu1 %1379 }
 0x226   : > { %v1401_v24 = vsel %vm1397_vm7, %v1378_v50, %v1380_v5  ;;  %v1433_v3 = vsel %vm1397_vm7, %v1380_v5, %v1378_v50  ;;  %v1366_v47 = vpop.permute.xlu0 %1365 }
 0x227   : > { %v1452_v18 = vmul.f32 %v3437_v32, %v1401_v24  ;;  %v1453_v46 = vmul.f32 %v3442_v36, %v1433_v3  ;;  %2105 = vmatmul.mubr.msk.bf16.vlgmr.msra.gmra.mxu1 %vm1577_vm8, %v2207_v14 }
 0x228   : > { %1850 = vmatprep.mubr.bf16.mxu1 %v2369_v0 }
 0x229   : > { %v1528_v11 = vpack.c.bf16 %v1452_v18, %v1450_v29  ;;  %v1368_v30 = vpop.permute.xlu1 %1367  ;;  %v1529_v26 = vpack.c.bf16 %v1453_v46, %v1451_v43 }
 0x22a   : > { %v1398_v4 = vsel %vm1397_vm7, %v1366_v47, %v1368_v30  ;;  %v1430_v28 = vsel %vm1397_vm7, %v1368_v30, %v1366_v47  ;;  %v1370_v20 = vpop.permute.xlu0 %1369 }
 0x22b   : > { %1679 = vmatprep.subr.bf16.mxu0 %v1529_v26  ;;  %v1446_v31 = vmul.f32 %v3437_v32, %v1398_v4  ;;  %v1447_v58 = vmul.f32 %v3442_v36, %v1430_v28 }
 0x22c   : > { %1680 = vmatpush1.bf16.msra.mxu0 %v1528_v11 }
 0x22d   : > { %v1372_v63 = vpop.permute.xlu1 %1371 }
 0x22e   : > { %v1399_v21 = vsel %vm1397_vm7, %v1370_v20, %v1372_v63  ;;  %v1431_v2 = vsel %vm1397_vm7, %v1372_v63, %v1370_v20 }
 0x22f   : > { %v1448_v61 = vmul.f32 %v3437_v32, %v1399_v21  ;;  %v1449_v35 = vmul.f32 %v3442_v36, %v1431_v2  ;;  %2106 = vmatmul.mubr.msk.bf16.gmra.mxu1 %vm1577_vm8, %v2208_v60 }
 0x230   : > { %1860 = vmatprep.mubr.bf16.mxu1 %v2369_v0 }
 0x231   : > { %v1526_v56 = vpack.c.bf16 %v1448_v61, %v1446_v31  ;;  %v1527_v53 = vpack.c.bf16 %v1449_v35, %v1447_v58 }
 0x233   : > { %1681 = vmatprep.subr.bf16.mxu0 %v1527_v53 }
 0x234   : > { %1682 = vmatpush1.bf16.msra.mxu0 %v1526_v56 }
 0x235   : > { %1806 = vmatprep.subr.bf16.mxu0 %v3093_v44  ;;  %v2211_v44 = vld [vmem:[%s3675_s5] sm:$0xff]  }
 0x237   : > { %2099 = vmatmul.mubr.msk.bf16.vlgmr.msra.gmra.mxu0 %vm1577_vm8, %v2209_v41  ;;  %2107 = vmatmul.mubr.msk.bf16.gmra.mxu1 %vm1577_vm8, %v2210_v55 }
 0x238   : > { %1807 = vmatpush1.bf16.msra.mxu0 %v3104_v22  ;;  %1830 = vmatprep.mubr.bf16.mxu0 %v2369_v0 }
 0x239   : > { %1808 = vmatprep.subr.bf16.mxu0 %v3108_v27 }
 0x23c   : > { %1809 = vmatpush1.bf16.msra.mxu0 %v3124_v19 }
 0x23d   : > { %1810 = vmatprep.subr.bf16.mxu0 %v3132_v38 }
 0x240   : > { %1811 = vmatpush1.bf16.msra.mxu0 %v3140_v8 }
 0x241   : > { %1812 = vmatprep.subr.bf16.mxu0 %v3152_v48 }
 0x244   : > { %1813 = vmatpush1.bf16.msra.mxu0 %v3160_v54 }
 0x247   : > { %2104 = vmatmul.mubr.msk.bf16.vlgmr.msra.gmra.mxu0 %vm1577_vm8, %v2211_v44 }
 0x248   : > { %2257 = shalt.err (!%p2254_p10)
}
 0x249   : > { %s2258_s11 = scalar_lea.hbm %s3523_s20, 2048  ;;  %s2262_s18 = scalar_lea.hbm %s3678_s8, 4096 }
 0x24a   : > { %p2259_p0 = scmp.ne.s32.totalorder %s3523_s20, %s2258_s11  ;;  %p2263_p1 = scmp.lt.s32.totalorder %s3523_s20, %s3678_s8 }
 0x24b   : > { %p2264_p3 = scmp.lt.s32.totalorder %s2262_s18, %s2258_s11 }
 0x24c   : > { %p2260_p2 = pnand %p2259_p0, %p3699_p12 }
 0x24d   : > { %p2265_p6 = por %p2264_p3, %p2263_p1 }
 0x24e   : > { %p2261_p9 = pneg %p2260_p2 }
 0x250   : > { %p2266_p11 = pnand %p2265_p6, %p2261_p9 }
 0x252   : > { %2269 = shalt.err (!%p2266_p11)
}
 0x253   : > { %s3688_s15 = smov 256   ;;  %s3700_s22 = scalar_lea.sflag [#allocation4], %s2536_s19  ;;  %v1545_v22 = vpop.permute.xlu0 %1544  ;;  %v1550_v19 = vpop.permute.xlu1 %1549 }
 0x254   : > { %2133 = dma.vmem_to_hbm [thread:$0]  (%p3699_p12), %s3525_s21, 2048, %s3523_s20, %s3700_s22, %s3688_s15, %s3688_s15, %s2370_s23  }
 0x255   : > { %s3558_s12 = scalar_lea.vmem [#allocation8], %s2539_s29  ;;  %s2090_s29 = sshll.u32 %s2536_s19, 5 }
 0x256   : > { %s388_s19 = scalar_lea.vmem [#allocation6], %s2090_s29  ;;  %s1896_s20 = sand.u32 1, %s2458_s17  }
 0x257   : > { %v3553_v38 = vpop.permute.xlu0 %1728  ;;  %v3555_v48 = vpop.permute.xlu1 %1733  ;;  %s1931_s21 = sshll.u32 %s388_s19, 4  ;;  %s2121_s28 = sshll.u32 %s2458_s17, 9  ;;  %s3573_s21 = int_to_ptr.vmem [resolvable:$true] %s1931_s21 }
 0x258   : > { %s3579_s24 = scalar_lea.hbm %s3679_s9, %s2121_s28  ;;  %s3582_s27 = scalar_lea.sflag [#allocation7], %s1896_s20 }
 0x259   : > { %s2270_s18 = scalar_lea.vmem %s3573_s21, 512  ;;  %s2380_s22 = smov [#allocation6]  }
 0x25a   : > { %p2271_p13 = scmp.ne.s32.totalorder %s3573_s21, %s2270_s18  ;;  %s2274_s29 = sshll.u32 %s2380_s22, 4  ;;  %s2275_s29 = int_to_ptr.vmem [resolvable:$false] %s2274_s29 }
 0x25b   : > { %v1739_v32 = vpop.permute.xlu0 %1738  ;;  %v1744_v57 = vpop.permute.xlu1 %1743  ;;  %s2276_s15 = scalar_lea.vmem %s2275_s29, 1024  ;;  %p2277_p7 = scmp.lt.s32.totalorder %s3573_s21, %s2275_s29 }
 0x25c   : > { %p2272_p4 = pnand %p2271_p13, %p3699_p12  ;;  %p2278_p8 = scmp.lt.s32.totalorder %s2276_s15, %s2270_s18 }
 0x25e   : > { %p2273_p5 = pneg %p2272_p4  ;;  %p2279_p10 = por %p2278_p8, %p2277_p7 }
 0x25f   : > { %v1749_v6 = vpop.permute.xlu0 %1748  ;;  %v1754_v23 = vpop.permute.xlu1 %1753 }
 0x260   : > { %p2280_p0 = pnand %p2279_p10, %p2273_p5 }
 0x263   : > { %v1759_v37 = vpop.permute.xlu0 %1758  ;;  %v1764_v47 = vpop.permute.xlu1 %1763 }
 0x2cf   : > { %v1615_v62 = vpop.f32.mrf.mxu0 }
 0x2d0   : > { %v1616_v34 = vadd.f32 %v1615_v62, %v1545_v22 }
 0x2d1   : > { %v1617_v13 = vpop.f32.mrf.mxu0 }
 0x2d2   : > { %v1618_v50 = vadd.f32 %v1617_v13, %v1545_v22 }
 0x2d3   : > { %v1619_v51 = vpop.f32.mrf.mxu0 }
 0x2d4   : > { %v1620_v24 = vadd.f32 %v1619_v51, %v1550_v19 }
 0x2d5   : > { %v1621_v25 = vpop.f32.mrf.mxu0 }
 0x2d6   : > { %v1622_v11 = vadd.f32 %v1621_v25, %v1550_v19 }
 0x2d7   : > { %v1658_v0 = vpop.f32.mrf.mxu1 }
 0x2d8   : > { %v1659_v14 = vadd.f32 %v1658_v0, %v1616_v34 }
 0x2d9   : > { %v1660_v27 = vpop.f32.mrf.mxu1 }
 0x2da   : > { %v1661_v3 = vadd.f32 %v1660_v27, %v1618_v50 }
 0x2db   : > { %v1662_v8 = vpop.f32.mrf.mxu1 }
 0x2dc   : > { %v1663_v30 = vadd.f32 %v1662_v8, %v1620_v24 }
 0x2dd   : > { %v1664_v54 = vpop.f32.mrf.mxu1 }
 0x2de   : > { %v1665_v20 = vadd.f32 %v1664_v54, %v1622_v11 }
 0x2e7   : > { %v1842_v36 = vpop.f32.mrf.mxu1 }
 0x2e8   : > { %v1843_v7 = vadd.f32 %v1842_v36, %v1739_v32 }
 0x2e9   : > { %v1844_v1 = vpop.f32.mrf.mxu1 }
 0x2ea   : > { %1879 = vst [vmem:[%s3558_s12 + $0x20] sm:$0xff] %v1843_v7  ;;  %v1845_v42 = vadd.f32 %v1844_v1, %v1739_v32 }
 0x2eb   : > { %v1846_v39 = vpop.f32.mrf.mxu1 }
 0x2ec   : > { %1880 = vst [vmem:[%s3558_s12 + $0x28] sm:$0xff] %v1845_v42  ;;  %v1847_v45 = vadd.f32 %v1846_v39, %v1744_v57 }
 0x2ed   : > { %v1848_v59 = vpop.f32.mrf.mxu1 }
 0x2ee   : > { %1881 = vst [vmem:[%s3558_s12 + $0x30] sm:$0xff] %v1847_v45  ;;  %v1849_v12 = vadd.f32 %v1848_v59, %v1744_v57 }
 0x2ef   : > { %v1852_v40 = vpop.f32.mrf.mxu1 }
 0x2f0   : > { %1882 = vst [vmem:[%s3558_s12 + $0x38] sm:$0xff] %v1849_v12  ;;  %v1853_v9 = vadd.f32 %v1852_v40, %v1749_v6 }
 0x2f1   : > { %v1854_v10 = vpop.f32.mrf.mxu1 }
 0x2f2   : > { %1883 = vst [vmem:[%s3558_s12 + $0x40] sm:$0xff] %v1853_v9  ;;  %v1855_v15 = vadd.f32 %v1854_v10, %v1749_v6 }
 0x2f3   : > { %v1856_v33 = vpop.f32.mrf.mxu1 }
 0x2f4   : > { %1884 = vst [vmem:[%s3558_s12 + $0x48] sm:$0xff] %v1855_v15  ;;  %v1857_v52 = vadd.f32 %v1856_v33, %v1754_v23 }
 0x2f5   : > { %v1858_v49 = vpop.f32.mrf.mxu1 }
 0x2f6   : > { %1885 = vst [vmem:[%s3558_s12 + $0x50] sm:$0xff] %v1857_v52  ;;  %v1859_v17 = vadd.f32 %v1858_v49, %v1754_v23 }
 0x2f7   : > { %v1701_v16 = vpop.f32.mrf.mxu0  ;;  %v1862_v5 = vpop.f32.mrf.mxu1 }
 0x2f8   : > { %1886 = vst [vmem:[%s3558_s12 + $0x58] sm:$0xff] %v1859_v17  ;;  %v1702_v29 = vadd.f32 %v1701_v16, %v1659_v14  ;;  %v1863_v43 = vadd.f32 %v1862_v5, %v1759_v37 }
 0x2f9   : > { %v1703_v18 = vpop.f32.mrf.mxu0  ;;  %v1864_v46 = vpop.f32.mrf.mxu1 }
 0x2fa   : > { %1871 = vst [vmem:[%s388_s19] sm:$0xff] %v1702_v29  ;;  %1887 = vst [vmem:[%s3558_s12 + $0x60] sm:$0xff] %v1863_v43  ;;  %v1704_v26 = vadd.f32 %v1703_v18, %v1661_v3  ;;  %v1865_v60 = vadd.f32 %v1864_v46, %v1759_v37 }
 0x2fb   : > { %v1705_v4 = vpop.f32.mrf.mxu0  ;;  %v1866_v28 = vpop.f32.mrf.mxu1 }
 0x2fc   : > { %1872 = vst [vmem:[%s388_s19 + $0x8] sm:$0xff] %v1704_v26  ;;  %1888 = vst [vmem:[%s3558_s12 + $0x68] sm:$0xff] %v1865_v60  ;;  %v1706_v63 = vadd.f32 %v1705_v4, %v1663_v30  ;;  %v1867_v21 = vadd.f32 %v1866_v28, %v1764_v47 }
 0x2fd   : > { %v1707_v2 = vpop.f32.mrf.mxu0  ;;  %v1868_v31 = vpop.f32.mrf.mxu1 }
 0x2fe   : > { %1873 = vst [vmem:[%s388_s19 + $0x10] sm:$0xff] %v1706_v63  ;;  %1889 = vst [vmem:[%s3558_s12 + $0x70] sm:$0xff] %v1867_v21  ;;  %v1708_v58 = vadd.f32 %v1707_v2, %v1665_v20  ;;  %v1869_v61 = vadd.f32 %v1868_v31, %v1764_v47 }
 0x300   : > { %1874 = vst [vmem:[%s388_s19 + $0x18] sm:$0xff] %v1708_v58  ;;  %1890 = vst [vmem:[%s3558_s12 + $0x78] sm:$0xff] %v1869_v61 }
 0x301   : > { %2283 = shalt.err (!%p2280_p0)
}
 0x302   : > { %s2284_s19 = scalar_lea.hbm %s3579_s24, 512  ;;  %s2288_s30 = scalar_lea.hbm %s3679_s9, 1024 }
 0x303   : > { %p2285_p2 = scmp.ne.s32.totalorder %s3579_s24, %s2284_s19  ;;  %p2289_p3 = scmp.lt.s32.totalorder %s3579_s24, %s3679_s9 }
 0x304   : > { %p2290_p6 = scmp.lt.s32.totalorder %s2288_s30, %s2284_s19 }
 0x305   : > { %p2286_p9 = pnand %p2285_p2, %p3699_p12 }
 0x306   : > { %p2291_p11 = por %p2290_p6, %p2289_p3 }
 0x307   : > { %p2287_p1 = pneg %p2286_p9 }
 0x309   : > { %p2292_p13 = pnand %p2291_p11, %p2287_p1 }
 0x30b   : > { %2295 = shalt.err (!%p2292_p13)
}
 0x30c   : > { %s3701_s15 = smov 256   ;;  %v1832_v35 = vpop.f32.mrf.mxu0  ;;  %s1947_s18 = sshll.u32 %s3558_s12, 4  ;;  %s3623_s18 = int_to_ptr.vmem [resolvable:$true] %s1947_s18 }
 0x30d   : > { %2134 = dma.vmem_to_hbm [thread:$0]  (%p3699_p12), %s3573_s21, 512, %s3579_s24, %s3582_s27, %s3701_s15, %s3701_s15, %s2370_s23   ;;  %v1833_v56 = vadd.f32 %v1832_v35, %v3553_v38 }
 0x30e   : > { %v1834_v53 = vpop.f32.mrf.mxu0  ;;  %s3702_s29 = sshll.u32 %s2458_s17, 11  ;;  %s2296_s20 = scalar_lea.vmem %s3623_s18, 2048 }
 0x30f   : > { %1875 = vst [vmem:[%s3558_s12] sm:$0xff] %v1833_v56  ;;  %v1835_v41 = vadd.f32 %v1834_v53, %v3553_v38  ;;  %s3621_s24 = scalar_lea.hbm %s3680_s10, %s3702_s29  ;;  %p2297_p4 = scmp.ne.s32.totalorder %s3623_s18, %s2296_s20 }
 0x310   : > { %v1836_v55 = vpop.f32.mrf.mxu0  ;;  %s2381_s28 = smov [#allocation8]  }
 0x311   : > { %1876 = vst [vmem:[%s3558_s12 + $0x8] sm:$0xff] %v1835_v41  ;;  %v1837_v44 = vadd.f32 %v1836_v55, %v3555_v48  ;;  %p2298_p5 = pnand %p2297_p4, %p3699_p12  ;;  %s2300_s30 = sshll.u32 %s2381_s28, 4  ;;  %s2301_s30 = int_to_ptr.vmem [resolvable:$false] %s2300_s30 }
 0x312   : > { %v1838_v0 = vpop.f32.mrf.mxu0  ;;  %s2302_s17 = scalar_lea.vmem %s2301_s30, 4096  ;;  %p2303_p8 = scmp.lt.s32.totalorder %s3623_s18, %s2301_s30 }
 0x313   : > { %1877 = vst [vmem:[%s3558_s12 + $0x10] sm:$0xff] %v1837_v44  ;;  %v1839_v22 = vadd.f32 %v1838_v0, %v3555_v48  ;;  %p2299_p7 = pneg %p2298_p5  ;;  %p2304_p10 = scmp.lt.s32.totalorder %s2302_s17, %s2296_s20 }
 0x315   : > { %1878 = vst [vmem:[%s3558_s12 + $0x18] sm:$0xff] %v1839_v22  ;;  %p2305_p0 = por %p2304_p10, %p2303_p8 }
 0x317   : > { %p2306_p2 = pnand %p2305_p0, %p2299_p7 }
 0x319   : > { %2309 = shalt.err (!%p2306_p2)
}
 0x31a   : > { %s2310_s11 = scalar_lea.hbm %s3621_s24, 2048  ;;  %s2314_s29 = scalar_lea.hbm %s3680_s10, 4096 }
 0x31b   : > { %p2311_p9 = scmp.ne.s32.totalorder %s3621_s24, %s2310_s11  ;;  %p2315_p6 = scmp.lt.s32.totalorder %s3621_s24, %s3680_s10 }
 0x31c   : > { %p2316_p11 = scmp.lt.s32.totalorder %s2314_s29, %s2310_s11 }
 0x31d   : > { %p2312_p1 = pnand %p2311_p9, %p3699_p12 }
 0x31e   : > { %p2317_p13 = por %p2316_p11, %p2315_p6 }
 0x31f   : > { %p2313_p3 = pneg %p2312_p1 }
 0x321   : > { %p2318_p4 = pnand %p2317_p13, %p2313_p3 }
 0x323   : > { %2321 = shalt.err (!%p2318_p4)
}
 0x324   : > { %2135 = dma.vmem_to_hbm [thread:$0]  (%p3699_p12), %s3623_s18, 2048, %s3621_s24, %s3582_s27, %s3701_s15, %s3701_s15, %s2370_s23  }
 0x325 PF: > { %s1962_s20 = sand.u32 1, %s2352_s13   ;;  %p3703_p5 = scmp.ne.s32.totalorder %s3696_s26, 0 }
 0x326   : > { %p3704_p7 = scmp.ge.s32.totalorder %s2364_s16, 2  ;;  %s1963_s28 = scalar_lea.sflag [#allocation4], %s1962_s20 }
 0x328   : > { %p2144_p8 = pnand %p3704_p7, %p3703_p5 }
 0x32a   : > { %p2145_p10 = pneg %p2144_p8 }
 0x32c   : > { %2343 = dma.done.wait (%p2145_p10), %s1963_s28, 2048  }
 0x32d   : > { %2345 = vsyncadd (%p2145_p10), %s1963_s28, 4294965248  ;;  %s3705_s25 = sadd.s32 4294967294, %s2364_s16  }
 0x32e   : > { %s1971_s30 = sand.u32 1, %s3705_s25  }
 0x32f   : > { %s1972_s17 = scalar_lea.sflag [#allocation7], %s1971_s30 }
 0x330   : > { %2347 = dma.done.wait (%p2145_p10), %s1972_s17, 2560  }
 0x331   : > { %2349 = vsyncadd (%p2145_p10), %s1972_s17, 4294964736  ;;  %s3706_s16 = sld [smem:[#allocation13_spill]]  ;;  %s3709_s13 = smov %s2356_s14 }
 0x332   : > { %s3707_s23 = sld [smem:[#allocation12_spill]] }
 0x333   : > { %s3708_s15 = sld [smem:[#allocation14_spill]] }
 0x337   : > { %p27_p12 = scmp.ge.s32.totalorder %s3706_s16, 4  }
 0x338   : > { %s3710_s14 = smov %s3707_s23 }
 0x339   :  { %29 = sbr.rel (!%p27_p12) target bundleno = 7 (0x7), region = 129 }
 0x33e   :  { %1986 = vsyncpa [#allocation3], 1 }
 0x33f   :  { %1988 = vsyncpa [#allocation3 + $0x1], 1 }
 0x340   :  { %1989 = vsyncpa [#allocation4], 1 }
 0x341   :  { %1991 = vsyncpa [#allocation4 + $0x1], 1 }
 0x342   :  { %1992 = vsyncpa [#allocation7], 1 }
 0x343   :  { %1994 = vsyncpa [#allocation7 + $0x1], 1 }

</bundles_post_ra>
